<compile_context>
chip_gen: v5e
topology: v5e:2x2
jax: 0.10.0
libtpu: 0.0.40
codegen_flags: <defaults>
</compile_context>

<pallas_src>
import functools

import numpy as np
import jax
import jax.numpy as jnp
from jax import lax
from jax.experimental import pallas as pl
from jax.experimental.pallas import tpu as pltpu

FEAT_DIM = 26        # adaptive-pool output width == Linear in-features
CONV_K = 5           # conv kernel (5,1), padding (2,0)
POOL_K = 5           # max pool (5,5), stride 1, padding (2,2)
_HALF = CONV_K // 2  # radius 2 (same for conv and max pool)
_HALO = 2 * _HALF    # total time halo (conv + pool) = 4
_LANE = 128
_SUBLANE = 8
_VMEM_BUDGET = 6 << 20   # per-block working-set target (bytes)


def _round_up(x, m):
    return (x + m - 1) // m * m


def _num_tensorcores_per_chip():
    """Best-effort detection of multi-TensorCore chips (v7x)."""
    try:
        kind = jax.devices()[0].device_kind.lower()
    except Exception:
        return 1
    return 2 if "v7" in kind else 1


def _adaptive_pool_matrix(w_in, w_out):
    """P s.t. (z @ P)[:, j] == mean of z over PyTorch adaptive bin j."""
    P = np.zeros((w_in, w_out), dtype=np.float32)
    for j in range(w_out):
        start = (j * w_in) // w_out
        end = -((-(j + 1) * w_in) // w_out)     # ceil((j+1)*w_in / w_out)
        P[start:end, j] = 1.0 / (end - start)
    return P


def _vad_kernel(wc_ref, bias_ref, tidx_ref, x_ref, v_ref, o_ref, *, valid_t):
    """One grid step: a block of batch elements, time flattened onto sublanes.

    wc_ref   (5,)        SMEM  conv1 taps (5-tap FIR along time)
    bias_ref (1,)        SMEM  fused bias = lin2.b + conv1.b * sum(lin2.w)
    tidx_ref (rows, 1)   VMEM  per-row frame index t in [0, Tp)
    x_ref    (rows, W)   VMEM  fbank block (batch*time -> sublanes, freq -> lanes)
    v_ref    (1, lanes)  VMEM  fused (adaptive-pool @ lin2.w), lane padded
    o_ref    (rows, 1)   VMEM  per-frame VAD activation (post ReLU)
    """
    rows, w_in = x_ref.shape
    lanes = v_ref.shape[-1]
    neg_inf = jnp.float32(-jnp.inf)
    shifts = [s for s in range(-_HALF, _HALF + 1) if s != 0]

    # ---- hoisted, batch-invariant scalars / masks (built once per step) ----
    taps = [wc_ref[k] for k in range(CONV_K)]            # 5 SMEM scalar reads
    bias = bias_ref[0]
    v = v_ref[...]                                       # (1, lanes)
    t = tidx_ref[...]                                    # (rows, 1) frame idx
    wi = lax.broadcasted_iota(jnp.int32, (rows, lanes), 1)
    t_ok = {s: (t >= -s) if s < 0 else (t < valid_t - s) for s in shifts}
    w_ok = {s: (wi >= -s) if s < 0 else (wi < w_in - s) for s in shifts}

    # ---- whole-block load, upcast, single lane pad to a 128 multiple -------
    x = x_ref[...].astype(jnp.float32)
    if lanes > w_in:
        x = jnp.concatenate(
            [x, jnp.zeros((rows, lanes - w_in), jnp.float32)], axis=-1)

    # ---- Conv2d(1,1,(5,1), padding=(2,0)): 5-tap FIR along time ------------
    y = taps[_HALF] * x
    for k in range(CONV_K):
        s = k - _HALF
        if s == 0:
            continue
        shifted = pltpu.roll(x, (-s) % rows, axis=0)     # out[r] = x[r+s] (wrap)
        y = y + taps[k] * jnp.where(t_ok[s], shifted, 0.0)

    # ---- MaxPool2d((5,5), stride 1, pad (2,2)): separable, -inf edges ------
    mt = y
    for s in shifts:
        shifted = pltpu.roll(y, (-s) % rows, axis=0)
        mt = jnp.maximum(mt, jnp.where(t_ok[s], shifted, neg_inf))
    mw = mt
    for s in shifts:
        shifted = pltpu.roll(mt, (-s) % lanes, axis=1)
        mw = jnp.maximum(mw, jnp.where(w_ok[s], shifted, neg_inf))
    # Padded lanes of mw stay finite (the unshifted term mt is finite there)
    # and v is exactly zero beyond w_in, so no final lane mask is required.

    # ---- fused AdaptiveAvgPool(W->26) + Linear(26,1) + ReLU -----------------
    acc = jnp.sum(mw * v, axis=-1, keepdims=True)        # (rows, 1)
    o_ref[...] = jnp.maximum(acc + bias, 0.0)


def _forward_block(x, wc, bias, vp, b_blk, stream_dtype):
    """x: (N, T, W) float32 -> (N, T) float32 VAD activations."""
    N, T, W = x.shape
    lanes = vp.shape[-1]
    Tp = _round_up(T, _SUBLANE)
    cores = _num_tensorcores_per_chip()

    if b_blk is None:
        # real per-element footprint: double-buffered input block plus ~8 live
        # f32 intermediates at the padded 128-lane width
        bytes_per_elem = Tp * (2 * W * 4 + 8 * lanes * 4)
        b_blk = max(1, min(N, _VMEM_BUDGET // max(1, bytes_per_elem)))
    b_blk = max(1, min(b_blk, N))
    if cores >= 2 and N >= cores:
        # v7x: keep at least one grid block per TensorCore
        b_blk = min(b_blk, (N + cores - 1) // cores)

    n_blocks = pl.cdiv(N, b_blk)
    Np = n_blocks * b_blk
    if Np != N or Tp != T:
        x = jnp.pad(x, ((0, Np - N), (0, Tp - T), (0, 0)))

    xr = x.reshape(Np * Tp, W).astype(stream_dtype)
    t_idx = jnp.broadcast_to(jnp.arange(Tp, dtype=jnp.int32)[None, :],
                             (Np, Tp)).reshape(Np * Tp, 1)

    kernel = functools.partial(_vad_kernel, valid_t=T)
    rows_blk = b_blk * Tp

    def run(dim_sem):
        return pl.pallas_call(
            kernel,
            out_shape=jax.ShapeDtypeStruct((Np * Tp, 1), jnp.float32),
            grid=(n_blocks,),
            in_specs=[
                pl.BlockSpec(memory_space=pltpu.MemorySpace.SMEM),  # conv taps
                pl.BlockSpec(memory_space=pltpu.MemorySpace.SMEM),  # fused bias
                pl.BlockSpec((rows_blk, 1), lambda n: (n, 0)),      # frame idx
                pl.BlockSpec((rows_blk, W), lambda n: (n, 0)),      # fbank block
                pl.BlockSpec((1, lanes), lambda n: (0, 0)),         # fused weights
            ],
            out_specs=pl.BlockSpec((rows_blk, 1), lambda n: (n, 0)),
            compiler_params=pltpu.CompilerParams(
                dimension_semantics=dim_sem,
                vmem_limit_bytes=32 * 1024 * 1024),
        )(wc, bias, t_idx, xr, vp)

    if cores >= 2:
        sem = (getattr(pltpu, "CORE_PARALLEL", "parallel"),)
    else:
        sem = ("parallel",)
    try:
        out = run(sem)
    except Exception:                      # conservative fallback path
        out = run(("arbitrary",))
    return out.reshape(Np, Tp)[:N, :T]


def vad_layer_forward(x_nchw, conv_w, conv_b, lin2_w, lin2_b, *,
                      b_blk=None, time_chunk=1024, stream_dtype=jnp.float32):
    """x_nchw: (N, 1, T, W) -> (N, 1, T, 1) float32 (== Vad_layer.forward).

    stream_dtype=jnp.bfloat16 halves input DMA bytes on v6e/v7x at a small
    accuracy cost (kernel compute stays float32).
    """
    x = jnp.squeeze(x_nchw.astype(jnp.float32), axis=1)     # (N, T, W)
    N, T, W = x.shape

    wc = conv_w.reshape(CONV_K).astype(jnp.float32)         # (5,)
    bc = conv_b.reshape(()).astype(jnp.float32)             # ()
    w2 = lin2_w.reshape(FEAT_DIM).astype(jnp.float32)       # (26,)
    b2 = lin2_b.reshape(()).astype(jnp.float32)             # ()

    # Fuse AdaptiveAvgPool(W->26) with Linear(26,1): v = pool_mat @ w2.  The
    # conv bias commutes through max/avg/linear -> folded into the final bias.
    lanes = _round_up(W, _LANE)
    v = jnp.asarray(_adaptive_pool_matrix(W, FEAT_DIM)) @ w2        # (W,)
    vp = jnp.zeros((1, lanes), jnp.float32).at[0, :W].set(v)
    bias = (b2 + bc * jnp.sum(w2)).reshape(1)

    if T <= time_chunk:
        out = _forward_block(x, wc, bias, vp, b_blk, stream_dtype)
    else:
        # Long utterances: wrapper-side time tiles with a +-4 frame halo so a
        # single block never has to hold the whole utterance in VMEM.
        pieces = []
        start = 0
        while start < T:
            end = min(T, start + time_chunk)
            s0, e0 = max(0, start - _HALO), min(T, end + _HALO)
            piece = _forward_block(x[:, s0:e0, :], wc, bias, vp, b_blk,
                                   stream_dtype)
            pieces.append(piece[:, start - s0:start - s0 + (end - start)])
            start = end
        out = jnp.concatenate(pieces, axis=1)

    return out[:, None, :, None]                                    # (N,1,T,1)


def _ref_forward(x_nchw, conv_w, conv_b, lin2_w, lin2_b):
    """Independent NumPy reference of Vad_layer.forward."""
    x = np.asarray(x_nchw, np.float32)[:, 0]                        # (N, T, W)
    N, T, W = x.shape
    wc = np.asarray(conv_w, np.float32).reshape(CONV_K)
    bc = float(np.asarray(conv_b).reshape(1)[0])
    w2 = np.asarray(lin2_w, np.float32).reshape(FEAT_DIM)
    b2 = float(np.asarray(lin2_b).reshape(1)[0])

    xp = np.pad(x, ((0, 0), (2, 2), (0, 0)))
    y = np.zeros_like(x)
    for k in range(CONV_K):
        y += wc[k] * xp[:, k:k + T, :]
    y += bc

    yp = np.pad(y, ((0, 0), (2, 2), (2, 2)), constant_values=-np.inf)
    z = np.full_like(y, -np.inf)
    for dt in range(POOL_K):
        for dw in range(POOL_K):
            z = np.maximum(z, yp[:, dt:dt + T, dw:dw + W])

    a = np.zeros((N, T, FEAT_DIM), np.float32)
    for j in range(FEAT_DIM):
        s = (j * W) // FEAT_DIM
        e = -((-(j + 1) * W) // FEAT_DIM)
        a[:, :, j] = z[:, :, s:e].mean(axis=-1)

    out = a @ w2.reshape(-1, 1) + b2
    out = np.maximum(out, 0.0)
    return out[:, None, :, :]                                       # (N,1,T,1)


if __name__ == "__main__":
    key = jax.random.PRNGKey(0)
    k_x, k_cw, k_cb, k_lw, k_lb = jax.random.split(key, 5)

    N, T, W = 2, 16, 64          # batch, time frames, fbank bins
    x = jax.random.normal(k_x, (N, 1, T, W), jnp.float32)

    # deterministic parameter init mirroring Vad_layer.__init__
    conv_w = 1.0 + 0.1 * jax.random.normal(k_cw, (1, 1, CONV_K, 1), jnp.float32)
    conv_b = 0.1 * jax.random.normal(k_cb, (1,), jnp.float32)
    lin2_w = 1.0 + 0.1 * jax.random.normal(k_lw, (1, FEAT_DIM), jnp.float32)
    lin2_b = -16.0 + 1.0 * jax.random.normal(k_lb, (1,), jnp.float32)

    ref = _ref_forward(np.asarray(x), np.asarray(conv_w), np.asarray(conv_b),
                       np.asarray(lin2_w), np.asarray(lin2_b))

    out = jax.block_until_ready(
        vad_layer_forward(x, conv_w, conv_b, lin2_w, lin2_b))
    np.testing.assert_allclose(np.asarray(out), ref, rtol=1e-5, atol=1e-4)

    # also exercise the halo'd time-chunking path used for long utterances
    out_chunked = jax.block_until_ready(
        vad_layer_forward(x, conv_w, conv_b, lin2_w, lin2_b, time_chunk=8))
    np.testing.assert_allclose(np.asarray(out_chunked), ref,
                               rtol=1e-5, atol=1e-4)

    print("KERNEL_OK")
</pallas_src>

<mosaic_0001>
module attributes {stable_mosaic.version = 11 : i64} {
  func.func @_vad_kernel(%arg0: i32, %arg1: memref<5xf32, #tpu.memory_space<smem>>, %arg2: memref<1xf32, #tpu.memory_space<smem>>, %arg3: memref<32x1xi32, #tpu.memory_space<vmem>>, %arg4: memref<32x64xf32, #tpu.memory_space<vmem>>, %arg5: memref<1x128xf32, #tpu.memory_space<vmem>>, %arg6: memref<32x1xf32, #tpu.memory_space<vmem>>) attributes {dimension_semantics = [#tpu.dimension_semantics<parallel>], iteration_bounds = array<i64: 1>, scalar_prefetch = 0 : i64, scratch_operands = 0 : i64, tpu.core_type = #tpu.core_type<tc>, window_params = [{transform_indices = @transform_0, window_bounds = array<i64: 5>}, {transform_indices = @transform_1, window_bounds = array<i64: 1>}, {transform_indices = @transform_2, window_bounds = array<i64: 32, 1>}, {transform_indices = @transform_3, window_bounds = array<i64: 32, 64>}, {pipeline_mode = #tpu.pipeline_mode<synchronous>, transform_indices = @transform_4, window_bounds = array<i64: 1, 128>}, {transform_indices = @transform_5, window_bounds = array<i64: 32, 1>}]} {
    %c0 = arith.constant 0 : index
    %0 = memref.load %arg1[%c0] : memref<5xf32, #tpu.memory_space<smem>>
    %c1 = arith.constant 1 : index
    %1 = memref.load %arg1[%c1] : memref<5xf32, #tpu.memory_space<smem>>
    %c2 = arith.constant 2 : index
    %2 = memref.load %arg1[%c2] : memref<5xf32, #tpu.memory_space<smem>>
    %c3 = arith.constant 3 : index
    %3 = memref.load %arg1[%c3] : memref<5xf32, #tpu.memory_space<smem>>
    %c4 = arith.constant 4 : index
    %4 = memref.load %arg1[%c4] : memref<5xf32, #tpu.memory_space<smem>>
    %c0_0 = arith.constant 0 : index
    %5 = memref.load %arg2[%c0_0] : memref<1xf32, #tpu.memory_space<smem>>
    %c0_1 = arith.constant 0 : index
    %c0_2 = arith.constant 0 : index
    %6 = vector.load %arg5[%c0_1, %c0_2] : memref<1x128xf32, #tpu.memory_space<vmem>>, vector<1x128xf32>
    %c0_3 = arith.constant 0 : index
    %c0_4 = arith.constant 0 : index
    %7 = vector.load %arg3[%c0_3, %c0_4] : memref<32x1xi32, #tpu.memory_space<vmem>>, vector<32x1xi32>
    %8 = tpu.iota {dimensions = array<i32: 1>} : vector<32x128xi32>
    %c2_i32 = arith.constant 2 : i32
    %9 = vector.broadcast %c2_i32 : i32 to vector<32x1xi32>
    %10 = arith.cmpi sge, %7, %9 : vector<32x1xi32>
    %c1_i32 = arith.constant 1 : i32
    %11 = vector.broadcast %c1_i32 : i32 to vector<32x1xi32>
    %12 = arith.cmpi sge, %7, %11 : vector<32x1xi32>
    %c15_i32 = arith.constant 15 : i32
    %13 = vector.broadcast %c15_i32 : i32 to vector<32x1xi32>
    %14 = arith.cmpi slt, %7, %13 : vector<32x1xi32>
    %c14_i32 = arith.constant 14 : i32
    %15 = vector.broadcast %c14_i32 : i32 to vector<32x1xi32>
    %16 = arith.cmpi slt, %7, %15 : vector<32x1xi32>
    %c2_i32_5 = arith.constant 2 : i32
    %17 = vector.broadcast %c2_i32_5 : i32 to vector<32x128xi32>
    %18 = arith.cmpi sge, %8, %17 : vector<32x128xi32>
    %c1_i32_6 = arith.constant 1 : i32
    %19 = vector.broadcast %c1_i32_6 : i32 to vector<32x128xi32>
    %20 = arith.cmpi sge, %8, %19 : vector<32x128xi32>
    %c63_i32 = arith.constant 63 : i32
    %21 = vector.broadcast %c63_i32 : i32 to vector<32x128xi32>
    %22 = arith.cmpi slt, %8, %21 : vector<32x128xi32>
    %c62_i32 = arith.constant 62 : i32
    %23 = vector.broadcast %c62_i32 : i32 to vector<32x128xi32>
    %24 = arith.cmpi slt, %8, %23 : vector<32x128xi32>
    %c0_7 = arith.constant 0 : index
    %c0_8 = arith.constant 0 : index
    %25 = vector.load %arg4[%c0_7, %c0_8] : memref<32x64xf32, #tpu.memory_space<vmem>>, vector<32x64xf32>
    %cst = arith.constant 0.000000e+00 : f32
    %26 = vector.broadcast %cst : f32 to vector<32x64xf32>
    %27 = tpu.concatenate %25, %26 in 1 : vector<32x64xf32>, vector<32x64xf32> -> vector<32x128xf32>
    %28 = vector.broadcast %2 : f32 to vector<32x128xf32>
    %29 = arith.mulf %28, %27 : vector<32x128xf32>
    %c2_i32_9 = arith.constant 2 : i32
    %30 = tpu.dynamic_rotate %27 by %c2_i32_9 dim 0 : vector<32x128xf32>, i32 -> vector<32x128xf32>
    %cst_10 = arith.constant 0.000000e+00 : f32
    %31 = vector.shape_cast %10 : vector<32x1xi1> to vector<32x1xi1>
    %32 = vector.broadcast %31 : vector<32x1xi1> to vector<32x128xi1>
    %33 = vector.broadcast %cst_10 : f32 to vector<32x128xf32>
    %34 = arith.select %32, %30, %33 : vector<32x128xi1>, vector<32x128xf32>
    %35 = vector.broadcast %0 : f32 to vector<32x128xf32>
    %36 = arith.mulf %35, %34 : vector<32x128xf32>
    %37 = arith.addf %29, %36 : vector<32x128xf32>
    %c1_i32_11 = arith.constant 1 : i32
    %38 = tpu.dynamic_rotate %27 by %c1_i32_11 dim 0 : vector<32x128xf32>, i32 -> vector<32x128xf32>
    %cst_12 = arith.constant 0.000000e+00 : f32
    %39 = vector.shape_cast %12 : vector<32x1xi1> to vector<32x1xi1>
    %40 = vector.broadcast %39 : vector<32x1xi1> to vector<32x128xi1>
    %41 = vector.broadcast %cst_12 : f32 to vector<32x128xf32>
    %42 = arith.select %40, %38, %41 : vector<32x128xi1>, vector<32x128xf32>
    %43 = vector.broadcast %1 : f32 to vector<32x128xf32>
    %44 = arith.mulf %43, %42 : vector<32x128xf32>
    %45 = arith.addf %37, %44 : vector<32x128xf32>
    %c31_i32 = arith.constant 31 : i32
    %46 = tpu.dynamic_rotate %27 by %c31_i32 dim 0 : vector<32x128xf32>, i32 -> vector<32x128xf32>
    %cst_13 = arith.constant 0.000000e+00 : f32
    %47 = vector.shape_cast %14 : vector<32x1xi1> to vector<32x1xi1>
    %48 = vector.broadcast %47 : vector<32x1xi1> to vector<32x128xi1>
    %49 = vector.broadcast %cst_13 : f32 to vector<32x128xf32>
    %50 = arith.select %48, %46, %49 : vector<32x128xi1>, vector<32x128xf32>
    %51 = vector.broadcast %3 : f32 to vector<32x128xf32>
    %52 = arith.mulf %51, %50 : vector<32x128xf32>
    %53 = arith.addf %45, %52 : vector<32x128xf32>
    %c30_i32 = arith.constant 30 : i32
    %54 = tpu.dynamic_rotate %27 by %c30_i32 dim 0 : vector<32x128xf32>, i32 -> vector<32x128xf32>
    %cst_14 = arith.constant 0.000000e+00 : f32
    %55 = vector.shape_cast %16 : vector<32x1xi1> to vector<32x1xi1>
    %56 = vector.broadcast %55 : vector<32x1xi1> to vector<32x128xi1>
    %57 = vector.broadcast %cst_14 : f32 to vector<32x128xf32>
    %58 = arith.select %56, %54, %57 : vector<32x128xi1>, vector<32x128xf32>
    %59 = vector.broadcast %4 : f32 to vector<32x128xf32>
    %60 = arith.mulf %59, %58 : vector<32x128xf32>
    %61 = arith.addf %53, %60 : vector<32x128xf32>
    %c2_i32_15 = arith.constant 2 : i32
    %62 = tpu.dynamic_rotate %61 by %c2_i32_15 dim 0 : vector<32x128xf32>, i32 -> vector<32x128xf32>
    %cst_16 = arith.constant 0xFF800000 : f32
    %63 = vector.shape_cast %10 : vector<32x1xi1> to vector<32x1xi1>
    %64 = vector.broadcast %63 : vector<32x1xi1> to vector<32x128xi1>
    %65 = vector.broadcast %cst_16 : f32 to vector<32x128xf32>
    %66 = arith.select %64, %62, %65 : vector<32x128xi1>, vector<32x128xf32>
    %67 = arith.maximumf %61, %66 : vector<32x128xf32>
    %c1_i32_17 = arith.constant 1 : i32
    %68 = tpu.dynamic_rotate %61 by %c1_i32_17 dim 0 : vector<32x128xf32>, i32 -> vector<32x128xf32>
    %cst_18 = arith.constant 0xFF800000 : f32
    %69 = vector.shape_cast %12 : vector<32x1xi1> to vector<32x1xi1>
    %70 = vector.broadcast %69 : vector<32x1xi1> to vector<32x128xi1>
    %71 = vector.broadcast %cst_18 : f32 to vector<32x128xf32>
    %72 = arith.select %70, %68, %71 : vector<32x128xi1>, vector<32x128xf32>
    %73 = arith.maximumf %67, %72 : vector<32x128xf32>
    %c31_i32_19 = arith.constant 31 : i32
    %74 = tpu.dynamic_rotate %61 by %c31_i32_19 dim 0 : vector<32x128xf32>, i32 -> vector<32x128xf32>
    %cst_20 = arith.constant 0xFF800000 : f32
    %75 = vector.shape_cast %14 : vector<32x1xi1> to vector<32x1xi1>
    %76 = vector.broadcast %75 : vector<32x1xi1> to vector<32x128xi1>
    %77 = vector.broadcast %cst_20 : f32 to vector<32x128xf32>
    %78 = arith.select %76, %74, %77 : vector<32x128xi1>, vector<32x128xf32>
    %79 = arith.maximumf %73, %78 : vector<32x128xf32>
    %c30_i32_21 = arith.constant 30 : i32
    %80 = tpu.dynamic_rotate %61 by %c30_i32_21 dim 0 : vector<32x128xf32>, i32 -> vector<32x128xf32>
    %cst_22 = arith.constant 0xFF800000 : f32
    %81 = vector.shape_cast %16 : vector<32x1xi1> to vector<32x1xi1>
    %82 = vector.broadcast %81 : vector<32x1xi1> to vector<32x128xi1>
    %83 = vector.broadcast %cst_22 : f32 to vector<32x128xf32>
    %84 = arith.select %82, %80, %83 : vector<32x128xi1>, vector<32x128xf32>
    %85 = arith.maximumf %79, %84 : vector<32x128xf32>
    %c2_i32_23 = arith.constant 2 : i32
    %86 = tpu.dynamic_rotate %85 by %c2_i32_23 dim 1 : vector<32x128xf32>, i32 -> vector<32x128xf32>
    %cst_24 = arith.constant 0xFF800000 : f32
    %87 = vector.broadcast %cst_24 : f32 to vector<32x128xf32>
    %88 = arith.select %18, %86, %87 : vector<32x128xi1>, vector<32x128xf32>
    %89 = arith.maximumf %85, %88 : vector<32x128xf32>
    %c1_i32_25 = arith.constant 1 : i32
    %90 = tpu.dynamic_rotate %85 by %c1_i32_25 dim 1 : vector<32x128xf32>, i32 -> vector<32x128xf32>
    %cst_26 = arith.constant 0xFF800000 : f32
    %91 = vector.broadcast %cst_26 : f32 to vector<32x128xf32>
    %92 = arith.select %20, %90, %91 : vector<32x128xi1>, vector<32x128xf32>
    %93 = arith.maximumf %89, %92 : vector<32x128xf32>
    %c127_i32 = arith.constant 127 : i32
    %94 = tpu.dynamic_rotate %85 by %c127_i32 dim 1 : vector<32x128xf32>, i32 -> vector<32x128xf32>
    %cst_27 = arith.constant 0xFF800000 : f32
    %95 = vector.broadcast %cst_27 : f32 to vector<32x128xf32>
    %96 = arith.select %22, %94, %95 : vector<32x128xi1>, vector<32x128xf32>
    %97 = arith.maximumf %93, %96 : vector<32x128xf32>
    %c126_i32 = arith.constant 126 : i32
    %98 = tpu.dynamic_rotate %85 by %c126_i32 dim 1 : vector<32x128xf32>, i32 -> vector<32x128xf32>
    %cst_28 = arith.constant 0xFF800000 : f32
    %99 = vector.broadcast %cst_28 : f32 to vector<32x128xf32>
    %100 = arith.select %24, %98, %99 : vector<32x128xi1>, vector<32x128xf32>
    %101 = arith.maximumf %97, %100 : vector<32x128xf32>
    %102 = vector.broadcast %6 : vector<1x128xf32> to vector<32x128xf32>
    %103 = arith.mulf %101, %102 : vector<32x128xf32>
    %cst_29 = arith.constant dense<0.000000e+00> : vector<32xf32>
    %104 = vector.multi_reduction <add>, %103, %cst_29 [1] : vector<32x128xf32> to vector<32xf32>
    %105 = vector.shape_cast %104 : vector<32xf32> to vector<32x1xf32>
    %106 = vector.broadcast %5 : f32 to vector<32x1xf32>
    %107 = arith.addf %105, %106 : vector<32x1xf32>
    %cst_30 = arith.constant 0.000000e+00 : f32
    %108 = vector.broadcast %cst_30 : f32 to vector<32x1xf32>
    %109 = arith.maximumf %107, %108 : vector<32x1xf32>
    %c0_31 = arith.constant 0 : index
    %c0_32 = arith.constant 0 : index
    %110 = vector.load %arg6[%c0_31, %c0_32] : memref<32x1xf32, #tpu.memory_space<vmem>>, vector<32x1xf32>
    tpu.vector_store %arg6[%c0_31, %c0_32], %109 {strides = array<i32>} : memref<32x1xf32, #tpu.memory_space<vmem>>, vector<32x1xf32>,
    return
  }
  func.func @transform_0(%arg0: i32) -> i32 {
    %c0_i32 = arith.constant 0 : i32
    %c0_i32_0 = arith.constant 0 : i32
    return %c0_i32 : i32
  }
  func.func @transform_1(%arg0: i32) -> i32 {
    %c0_i32 = arith.constant 0 : i32
    %c0_i32_0 = arith.constant 0 : i32
    return %c0_i32 : i32
  }
  func.func @transform_2(%arg0: i32) -> (i32, i32) {
    %c0_i32 = arith.constant 0 : i32
    %c0_i32_0 = arith.constant 0 : i32
    return %arg0, %c0_i32 : i32, i32
  }
  func.func @transform_3(%arg0: i32) -> (i32, i32) {
    %c0_i32 = arith.constant 0 : i32
    %c0_i32_0 = arith.constant 0 : i32
    return %arg0, %c0_i32 : i32, i32
  }
  func.func @transform_4(%arg0: i32) -> (i32, i32) {
    %c0_i32 = arith.constant 0 : i32
    %c0_i32_0 = arith.constant 0 : i32
    %c0_i32_1 = arith.constant 0 : i32
    return %c0_i32, %c0_i32_0 : i32, i32
  }
  func.func @transform_5(%arg0: i32) -> (i32, i32) {
    %c0_i32 = arith.constant 0 : i32
    %c0_i32_0 = arith.constant 0 : i32
    return %arg0, %c0_i32 : i32, i32
  }
}

module attributes {stable_mosaic.version = 11 : i64} {
  func.func @_vad_kernel(%arg0: i32, %arg1: memref<5xf32, #tpu.memory_space<smem>>, %arg2: memref<1xf32, #tpu.memory_space<smem>>, %arg3: memref<32x1xi32, #tpu.memory_space<vmem>>, %arg4: memref<32x64xf32, #tpu.memory_space<vmem>>, %arg5: memref<1x128xf32, #tpu.memory_space<vmem>>, %arg6: memref<32x1xf32, #tpu.memory_space<vmem>>) attributes {dimension_semantics = [#tpu.dimension_semantics<arbitrary>], iteration_bounds = array<i64: 1>, scalar_prefetch = 0 : i64, scratch_operands = 0 : i64, tpu.core_type = #tpu.core_type<tc>, window_params = [{transform_indices = @transform_0, window_bounds = array<i64: 5>}, {transform_indices = @transform_1, window_bounds = array<i64: 1>}, {transform_indices = @transform_2, window_bounds = array<i64: 32, 1>}, {transform_indices = @transform_3, window_bounds = array<i64: 32, 64>}, {pipeline_mode = #tpu.pipeline_mode<synchronous>, transform_indices = @transform_4, window_bounds = array<i64: 1, 128>}, {transform_indices = @transform_5, window_bounds = array<i64: 32, 1>}]} {
    %c0 = arith.constant 0 : index
    %0 = memref.load %arg1[%c0] : memref<5xf32, #tpu.memory_space<smem>>
    %c1 = arith.constant 1 : index
    %1 = memref.load %arg1[%c1] : memref<5xf32, #tpu.memory_space<smem>>
    %c2 = arith.constant 2 : index
    %2 = memref.load %arg1[%c2] : memref<5xf32, #tpu.memory_space<smem>>
    %c3 = arith.constant 3 : index
    %3 = memref.load %arg1[%c3] : memref<5xf32, #tpu.memory_space<smem>>
    %c4 = arith.constant 4 : index
    %4 = memref.load %arg1[%c4] : memref<5xf32, #tpu.memory_space<smem>>
    %c0_0 = arith.constant 0 : index
    %5 = memref.load %arg2[%c0_0] : memref<1xf32, #tpu.memory_space<smem>>
    %c0_1 = arith.constant 0 : index
    %c0_2 = arith.constant 0 : index
    %6 = vector.load %arg5[%c0_1, %c0_2] : memref<1x128xf32, #tpu.memory_space<vmem>>, vector<1x128xf32>
    %c0_3 = arith.constant 0 : index
    %c0_4 = arith.constant 0 : index
    %7 = vector.load %arg3[%c0_3, %c0_4] : memref<32x1xi32, #tpu.memory_space<vmem>>, vector<32x1xi32>
    %8 = tpu.iota {dimensions = array<i32: 1>} : vector<32x128xi32>
    %c2_i32 = arith.constant 2 : i32
    %9 = vector.broadcast %c2_i32 : i32 to vector<32x1xi32>
    %10 = arith.cmpi sge, %7, %9 : vector<32x1xi32>
    %c1_i32 = arith.constant 1 : i32
    %11 = vector.broadcast %c1_i32 : i32 to vector<32x1xi32>
    %12 = arith.cmpi sge, %7, %11 : vector<32x1xi32>
    %c15_i32 = arith.constant 15 : i32
    %13 = vector.broadcast %c15_i32 : i32 to vector<32x1xi32>
    %14 = arith.cmpi slt, %7, %13 : vector<32x1xi32>
    %c14_i32 = arith.constant 14 : i32
    %15 = vector.broadcast %c14_i32 : i32 to vector<32x1xi32>
    %16 = arith.cmpi slt, %7, %15 : vector<32x1xi32>
    %c2_i32_5 = arith.constant 2 : i32
    %17 = vector.broadcast %c2_i32_5 : i32 to vector<32x128xi32>
    %18 = arith.cmpi sge, %8, %17 : vector<32x128xi32>
    %c1_i32_6 = arith.constant 1 : i32
    %19 = vector.broadcast %c1_i32_6 : i32 to vector<32x128xi32>
    %20 = arith.cmpi sge, %8, %19 : vector<32x128xi32>
    %c63_i32 = arith.constant 63 : i32
    %21 = vector.broadcast %c63_i32 : i32 to vector<32x128xi32>
    %22 = arith.cmpi slt, %8, %21 : vector<32x128xi32>
    %c62_i32 = arith.constant 62 : i32
    %23 = vector.broadcast %c62_i32 : i32 to vector<32x128xi32>
    %24 = arith.cmpi slt, %8, %23 : vector<32x128xi32>
    %c0_7 = arith.constant 0 : index
    %c0_8 = arith.constant 0 : index
    %25 = vector.load %arg4[%c0_7, %c0_8] : memref<32x64xf32, #tpu.memory_space<vmem>>, vector<32x64xf32>
    %cst = arith.constant 0.000000e+00 : f32
    %26 = vector.broadcast %cst : f32 to vector<32x64xf32>
    %27 = tpu.concatenate %25, %26 in 1 : vector<32x64xf32>, vector<32x64xf32> -> vector<32x128xf32>
    %28 = vector.broadcast %2 : f32 to vector<32x128xf32>
    %29 = arith.mulf %28, %27 : vector<32x128xf32>
    %c2_i32_9 = arith.constant 2 : i32
    %30 = tpu.dynamic_rotate %27 by %c2_i32_9 dim 0 : vector<32x128xf32>, i32 -> vector<32x128xf32>
    %cst_10 = arith.constant 0.000000e+00 : f32
    %31 = vector.shape_cast %10 : vector<32x1xi1> to vector<32x1xi1>
    %32 = vector.broadcast %31 : vector<32x1xi1> to vector<32x128xi1>
    %33 = vector.broadcast %cst_10 : f32 to vector<32x128xf32>
    %34 = arith.select %32, %30, %33 : vector<32x128xi1>, vector<32x128xf32>
    %35 = vector.broadcast %0 : f32 to vector<32x128xf32>
    %36 = arith.mulf %35, %34 : vector<32x128xf32>
    %37 = arith.addf %29, %36 : vector<32x128xf32>
    %c1_i32_11 = arith.constant 1 : i32
    %38 = tpu.dynamic_rotate %27 by %c1_i32_11 dim 0 : vector<32x128xf32>, i32 -> vector<32x128xf32>
    %cst_12 = arith.constant 0.000000e+00 : f32
    %39 = vector.shape_cast %12 : vector<32x1xi1> to vector<32x1xi1>
    %40 = vector.broadcast %39 : vector<32x1xi1> to vector<32x128xi1>
    %41 = vector.broadcast %cst_12 : f32 to vector<32x128xf32>
    %42 = arith.select %40, %38, %41 : vector<32x128xi1>, vector<32x128xf32>
    %43 = vector.broadcast %1 : f32 to vector<32x128xf32>
    %44 = arith.mulf %43, %42 : vector<32x128xf32>
    %45 = arith.addf %37, %44 : vector<32x128xf32>
    %c31_i32 = arith.constant 31 : i32
    %46 = tpu.dynamic_rotate %27 by %c31_i32 dim 0 : vector<32x128xf32>, i32 -> vector<32x128xf32>
    %cst_13 = arith.constant 0.000000e+00 : f32
    %47 = vector.shape_cast %14 : vector<32x1xi1> to vector<32x1xi1>
    %48 = vector.broadcast %47 : vector<32x1xi1> to vector<32x128xi1>
    %49 = vector.broadcast %cst_13 : f32 to vector<32x128xf32>
    %50 = arith.select %48, %46, %49 : vector<32x128xi1>, vector<32x128xf32>
    %51 = vector.broadcast %3 : f32 to vector<32x128xf32>
    %52 = arith.mulf %51, %50 : vector<32x128xf32>
    %53 = arith.addf %45, %52 : vector<32x128xf32>
    %c30_i32 = arith.constant 30 : i32
    %54 = tpu.dynamic_rotate %27 by %c30_i32 dim 0 : vector<32x128xf32>, i32 -> vector<32x128xf32>
    %cst_14 = arith.constant 0.000000e+00 : f32
    %55 = vector.shape_cast %16 : vector<32x1xi1> to vector<32x1xi1>
    %56 = vector.broadcast %55 : vector<32x1xi1> to vector<32x128xi1>
    %57 = vector.broadcast %cst_14 : f32 to vector<32x128xf32>
    %58 = arith.select %56, %54, %57 : vector<32x128xi1>, vector<32x128xf32>
    %59 = vector.broadcast %4 : f32 to vector<32x128xf32>
    %60 = arith.mulf %59, %58 : vector<32x128xf32>
    %61 = arith.addf %53, %60 : vector<32x128xf32>
    %c2_i32_15 = arith.constant 2 : i32
    %62 = tpu.dynamic_rotate %61 by %c2_i32_15 dim 0 : vector<32x128xf32>, i32 -> vector<32x128xf32>
    %cst_16 = arith.constant 0xFF800000 : f32
    %63 = vector.shape_cast %10 : vector<32x1xi1> to vector<32x1xi1>
    %64 = vector.broadcast %63 : vector<32x1xi1> to vector<32x128xi1>
    %65 = vector.broadcast %cst_16 : f32 to vector<32x128xf32>
    %66 = arith.select %64, %62, %65 : vector<32x128xi1>, vector<32x128xf32>
    %67 = arith.maximumf %61, %66 : vector<32x128xf32>
    %c1_i32_17 = arith.constant 1 : i32
    %68 = tpu.dynamic_rotate %61 by %c1_i32_17 dim 0 : vector<32x128xf32>, i32 -> vector<32x128xf32>
    %cst_18 = arith.constant 0xFF800000 : f32
    %69 = vector.shape_cast %12 : vector<32x1xi1> to vector<32x1xi1>
    %70 = vector.broadcast %69 : vector<32x1xi1> to vector<32x128xi1>
    %71 = vector.broadcast %cst_18 : f32 to vector<32x128xf32>
    %72 = arith.select %70, %68, %71 : vector<32x128xi1>, vector<32x128xf32>
    %73 = arith.maximumf %67, %72 : vector<32x128xf32>
    %c31_i32_19 = arith.constant 31 : i32
    %74 = tpu.dynamic_rotate %61 by %c31_i32_19 dim 0 : vector<32x128xf32>, i32 -> vector<32x128xf32>
    %cst_20 = arith.constant 0xFF800000 : f32
    %75 = vector.shape_cast %14 : vector<32x1xi1> to vector<32x1xi1>
    %76 = vector.broadcast %75 : vector<32x1xi1> to vector<32x128xi1>
    %77 = vector.broadcast %cst_20 : f32 to vector<32x128xf32>
    %78 = arith.select %76, %74, %77 : vector<32x128xi1>, vector<32x128xf32>
    %79 = arith.maximumf %73, %78 : vector<32x128xf32>
    %c30_i32_21 = arith.constant 30 : i32
    %80 = tpu.dynamic_rotate %61 by %c30_i32_21 dim 0 : vector<32x128xf32>, i32 -> vector<32x128xf32>
    %cst_22 = arith.constant 0xFF800000 : f32
    %81 = vector.shape_cast %16 : vector<32x1xi1> to vector<32x1xi1>
    %82 = vector.broadcast %81 : vector<32x1xi1> to vector<32x128xi1>
    %83 = vector.broadcast %cst_22 : f32 to vector<32x128xf32>
    %84 = arith.select %82, %80, %83 : vector<32x128xi1>, vector<32x128xf32>
    %85 = arith.maximumf %79, %84 : vector<32x128xf32>
    %c2_i32_23 = arith.constant 2 : i32
    %86 = tpu.dynamic_rotate %85 by %c2_i32_23 dim 1 : vector<32x128xf32>, i32 -> vector<32x128xf32>
    %cst_24 = arith.constant 0xFF800000 : f32
    %87 = vector.broadcast %cst_24 : f32 to vector<32x128xf32>
    %88 = arith.select %18, %86, %87 : vector<32x128xi1>, vector<32x128xf32>
    %89 = arith.maximumf %85, %88 : vector<32x128xf32>
    %c1_i32_25 = arith.constant 1 : i32
    %90 = tpu.dynamic_rotate %85 by %c1_i32_25 dim 1 : vector<32x128xf32>, i32 -> vector<32x128xf32>
    %cst_26 = arith.constant 0xFF800000 : f32
    %91 = vector.broadcast %cst_26 : f32 to vector<32x128xf32>
    %92 = arith.select %20, %90, %91 : vector<32x128xi1>, vector<32x128xf32>
    %93 = arith.maximumf %89, %92 : vector<32x128xf32>
    %c127_i32 = arith.constant 127 : i32
    %94 = tpu.dynamic_rotate %85 by %c127_i32 dim 1 : vector<32x128xf32>, i32 -> vector<32x128xf32>
    %cst_27 = arith.constant 0xFF800000 : f32
    %95 = vector.broadcast %cst_27 : f32 to vector<32x128xf32>
    %96 = arith.select %22, %94, %95 : vector<32x128xi1>, vector<32x128xf32>
    %97 = arith.maximumf %93, %96 : vector<32x128xf32>
    %c126_i32 = arith.constant 126 : i32
    %98 = tpu.dynamic_rotate %85 by %c126_i32 dim 1 : vector<32x128xf32>, i32 -> vector<32x128xf32>
    %cst_28 = arith.constant 0xFF800000 : f32
    %99 = vector.broadcast %cst_28 : f32 to vector<32x128xf32>
    %100 = arith.select %24, %98, %99 : vector<32x128xi1>, vector<32x128xf32>
    %101 = arith.maximumf %97, %100 : vector<32x128xf32>
    %102 = vector.broadcast %6 : vector<1x128xf32> to vector<32x128xf32>
    %103 = arith.mulf %101, %102 : vector<32x128xf32>
    %cst_29 = arith.constant dense<0.000000e+00> : vector<32xf32>
    %104 = vector.multi_reduction <add>, %103, %cst_29 [1] : vector<32x128xf32> to vector<32xf32>
    %105 = vector.shape_cast %104 : vector<32xf32> to vector<32x1xf32>
    %106 = vector.broadcast %5 : f32 to vector<32x1xf32>
    %107 = arith.addf %105, %106 : vector<32x1xf32>
    %cst_30 = arith.constant 0.000000e+00 : f32
    %108 = vector.broadcast %cst_30 : f32 to vector<32x1xf32>
    %109 = arith.maximumf %107, %108 : vector<32x1xf32>
    %c0_31 = arith.constant 0 : index
    %c0_32 = arith.constant 0 : index
    %110 = vector.load %arg6[%c0_31, %c0_32] : memref<32x1xf32, #tpu.memory_space<vmem>>, vector<32x1xf32>
    tpu.vector_store %arg6[%c0_31, %c0_32], %109 {strides = array<i32>} : memref<32x1xf32, #tpu.memory_space<vmem>>, vector<32x1xf32>,
    return
  }
  func.func @transform_0(%arg0: i32) -> i32 {
    %c0_i32 = arith.constant 0 : i32
    %c0_i32_0 = arith.constant 0 : i32
    return %c0_i32 : i32
  }
  func.func @transform_1(%arg0: i32) -> i32 {
    %c0_i32 = arith.constant 0 : i32
    %c0_i32_0 = arith.constant 0 : i32
    return %c0_i32 : i32
  }
  func.func @transform_2(%arg0: i32) -> (i32, i32) {
    %c0_i32 = arith.constant 0 : i32
    %c0_i32_0 = arith.constant 0 : i32
    return %arg0, %c0_i32 : i32, i32
  }
  func.func @transform_3(%arg0: i32) -> (i32, i32) {
    %c0_i32 = arith.constant 0 : i32
    %c0_i32_0 = arith.constant 0 : i32
    return %arg0, %c0_i32 : i32, i32
  }
  func.func @transform_4(%arg0: i32) -> (i32, i32) {
    %c0_i32 = arith.constant 0 : i32
    %c0_i32_0 = arith.constant 0 : i32
    %c0_i32_1 = arith.constant 0 : i32
    return %c0_i32, %c0_i32_0 : i32, i32
  }
  func.func @transform_5(%arg0: i32) -> (i32, i32) {
    %c0_i32 = arith.constant 0 : i32
    %c0_i32_0 = arith.constant 0 : i32
    return %arg0, %c0_i32 : i32, i32
  }
}

</mosaic_0001>

<bundles_post_ra>
// kernel: tpu_custom_call.1
= control target key start
LH: loop header
LB: loop body
LE: loop exit
PB: predicated region body
PF: predicated region fallthrough
CT: control target
= control target key end

     0   :  { %11 = vsyncpa [#allocation4], 0  ;;  %s441_s21 = smov [#allocation3]   ;;  %s824_s0 = inlined_call_operand.vmem [shape: f32[5], index: 0, kind: input, shape index: {}]   ;;  %s825_s1 = inlined_call_operand.<no memory space> [shape: f32[1], index: 1, kind: input, shape index: {}]   ;;  %s826_s2 = inlined_call_operand.vmem [shape: s32[32,1], index: 2, kind: input, shape index: {}]   ;;  %s827_s3 = inlined_call_operand.vmem [shape: f32[32,64], index: 3, kind: input, shape index: {}]   ;;  %s828_s4 = inlined_call_operand.vmem [shape: f32[1,128], index: 4, kind: input, shape index: {}]   ;;  %s829_s5 = inlined_call_operand.vmem [shape: f32[32,1], index: 5, kind: output, shape index: {}]  }
   0x1   :  { %s17_s20 = sshll.u32 %s824_s0, 4  ;;  %s18_s20 = int_to_ptr.vmem [resolvable:$true] %s17_s20 }
   0x2   :  { %20 = dma.vmem_to_smem %s18_s20, 16, %s441_s21, [#allocation4]  }
   0x3   :  { %439 = dma.done.wait [#allocation4], 16  }
   0x4   :  { %440 = vsyncadd [#allocation4], 4294967280 }
   0x5   :  { %33 = sfence }
   0x6   :  { %v43_v0 = vld [vmem:[%s826_s2 + $0x10] sm:$0xff]  ;;  %v41_v1 = vld [vmem:[%s826_s2] sm:$0xff]  ;;  %v442_v2 = vmov 0   ;;  %v44_v6 = vld [vmem:[%s826_s2 + $0x18] sm:$0xff]  ;;  %v45_v26 = vlaneseq  ;;  %s413_s7 = sld [smem:[#allocation3 + $0x1]]  ;;  %s443_s15 = smov 2  }
   0x7   :  { %424 = vset.pattern.permute.xlu1 %v442_v2  ;;  %423 = vset.pattern.permute.xlu0 %v442_v2  ;;  %vm49_vm0 = vcmp.ge.s32.totalorder %v43_v0, 2  ;;  %vm47_vm1 = vcmp.ge.s32.totalorder %v41_v1, 2  ;;  %vm51_vm2 = vcmp.ge.s32.totalorder %v41_v1, 1  ;;  %v42_v7 = vld [vmem:[%s826_s2 + $0x8] sm:$0xff]  ;;  %vm50_vm3 = vcmp.ge.s32.totalorder %v44_v6, 2  ;;  %v67_v27 = vld [vmem:[%s827_s3] sm:$0xff] }
   0x8   :  { %v94_v3 = vsel %vm49_vm0, 1, %v442_v2  ;;  %v92_v4 = vsel %vm47_vm1, 1, %v442_v2  ;;  %425 = vset.pattern.permute.xlu2 %v442_v2  ;;  %v134_v5 = vsel %vm51_vm2, 1, %v442_v2  ;;  %vm48_vm4 = vcmp.ge.s32.totalorder %v42_v7, 2  ;;  %v70_v28 = vld [vmem:[%s827_s3 + $0x18] sm:$0xff]  ;;  %v68_v29 = vld [vmem:[%s827_s3 + $0x8] sm:$0xff] }
   0x9   :  { %103 = vperm.xlu1 %424, %v94_v3   ;;  %97 = vperm.xlu0 %423, %v92_v4   ;;  %vm52_vm5 = vcmp.ge.s32.totalorder %v42_v7, 1  ;;  %v95_v8 = vsel %vm50_vm3, 1, %v442_v2  ;;  %v93_v9 = vsel %vm48_vm4, 1, %v442_v2  ;;  %vm54_vm6 = vcmp.ge.s32.totalorder %v44_v6, 1  ;;  %v69_v30 = vld [vmem:[%s827_s3 + $0x10] sm:$0xff]  ;;  %s414_s12 = sld [smem:[#allocation3 + $0x2]] }
   0xa   :  { %139 = vperm.xlu2 %425, %v134_v5   ;;  %v135_v10 = vsel %vm52_vm5, 1, %v442_v2  ;;  %vm53_vm7 = vcmp.ge.s32.totalorder %v43_v0, 1  ;;  %vm55_vm8 = vcmp.lt.s32.totalorder %v41_v1, 15  ;;  %v137_v11 = vsel %vm54_vm6, 1, %v442_v2  ;;  %s415_s13 = sld [smem:[#allocation3 + $0x3]]  ;;  %s444_s16 = smov 1  }
   0xb   :  { %v136_v12 = vsel %vm53_vm7, 1, %v442_v2  ;;  %v176_v13 = vsel %vm55_vm8, 1, %v442_v2  ;;  %vm57_vm9 = vcmp.lt.s32.totalorder %v43_v0, 15  ;;  %vm56_vm10 = vcmp.lt.s32.totalorder %v42_v7, 15  ;;  %s34_s14 = sld [smem:[#allocation3]]  ;;  %s445_s17 = smov 127  }
   0xc   :  { %vm58_vm11 = vcmp.lt.s32.totalorder %v44_v6, 15  ;;  %v178_v14 = vsel %vm57_vm9, 1, %v442_v2  ;;  %v177_v15 = vsel %vm56_vm10, 1, %v442_v2  ;;  %vm60_vm12 = vcmp.lt.s32.totalorder %v42_v7, 14  ;;  %s592_s3 = sld [smem:[#allocation3 + $0x4]]  ;;  %s446_s18 = smov 126  }
   0xd   :  { %v179_v16 = vsel %vm58_vm11, 1, %v442_v2  ;;  %vm59_vm13 = vcmp.lt.s32.totalorder %v41_v1, 14  ;;  %vm61_vm14 = vcmp.lt.s32.totalorder %v43_v0, 14  ;;  %v219_v17 = vsel %vm60_vm12, 1, %v442_v2 }
   0xe   :  { %v218_v18 = vsel %vm59_vm13, 1, %v442_v2  ;;  %v220_v19 = vsel %vm61_vm14, 1, %v442_v2  ;;  %vm62_vm15 = vcmp.lt.s32.totalorder %v44_v6, 14  ;;  %vm71_vm0 = vcmask 523264  }
   0xf   :  { %v221_v20 = vsel %vm62_vm15, 1, %v442_v2  ;;  %v518_v33 = vsel %vm71_vm0, %v67_v27, 0.0  ;;  %v520_v34 = vsel %vm71_vm0, %v70_v28, 0.0  ;;  %v523_v35 = vshrl.u32 %v45_v26, 7 }
  0x10   :  { %v525_v36 = vsel %vm71_vm0, %v68_v29, 0.0  ;;  %v527_v37 = vsel %vm71_vm0, %v69_v30, 0.0  ;;  %v125_v38 = vrot.slane %v518_v33, 7  ;;  %v128_v39 = vrot.slane %v520_v34, 7 }
  0x11   :  { %106 = vperm.xlu1 %424, %v95_v8   ;;  %100 = vperm.xlu0 %423, %v93_v9   ;;  %vm129_vm1 = vcmp.lt.s32.totalorder %v523_v35, 1  ;;  %v126_v40 = vrot.slane %v525_v36, 7  ;;  %v167_v41 = vrot.slane %v518_v33, 1  ;;  %v168_v42 = vrot.slane %v525_v36, 1 }
  0x12   :  { %142 = vperm.xlu2 %425, %v135_v10   ;;  %v81_v43 = vrot.slane %v518_v33, 6  ;;  %v84_v44 = vrot.slane %v520_v34, 6  ;;  %vm171_vm2 = vcmp.lt.s32.totalorder %v523_v35, 7  ;;  %v83_v45 = vrot.slane %v527_v37, 6 }
  0x13   :  { %vm87_vm3 = vcmp.lt.s32.totalorder %v523_v35, 2  ;;  %v82_v47 = vrot.slane %v525_v36, 6  ;;  %v127_v48 = vrot.slane %v527_v37, 7  ;;  %v133_v49 = vsel %vm129_vm1, %v128_v39, %v125_v38 }
  0x14   :  { %v548_v50 = vstv %s413_s7  ;;  %v132_v51 = vsel %vm129_vm1, %v125_v38, %v126_v40  ;;  %v552_v52 = vstv %s414_s12  ;;  %v174_v53 = vsel %vm171_vm2, %v167_v41, %v168_v42 }
  0x15   :  { %v558_v54 = vstv %s415_s13  ;;  %v91_v55 = vsel %vm87_vm3, %v84_v44, %v81_v43  ;;  %v89_v58 = vsel %vm87_vm3, %v82_v47, %v83_v45  ;;  %v79_v59 = vmul.f32 %v552_v52, %v527_v37 }
  0x16   :  { %v573_v60 = vstv %s34_s14  ;;  %v77_v61 = vmul.f32 %v552_v52, %v518_v33  ;;  %v90_v62 = vsel %vm87_vm3, %v81_v43, %v82_v47  ;;  %v131_v63 = vsel %vm129_vm1, %v126_v40, %v127_v48 }
  0x17   :  { %v169_v1 = vrot.slane %v527_v37, 1  ;;  %v211_v4 = vrot.slane %v527_v37, 2  ;;  %v212_v5 = vrot.slane %v520_v34, 2  ;;  %v170_v6 = vrot.slane %v520_v34, 1 }
  0x18   :  { %vm213_vm11 = vcmp.lt.s32.totalorder %v523_v35, 6  ;;  %v88_v8 = vsel %vm87_vm3, %v83_v45, %v84_v44  ;;  %v210_v38 = vrot.slane %v525_v36, 2  ;;  %v209_v43 = vrot.slane %v518_v33, 2 }
  0x19   :  { %148 = vperm.xlu1 %424, %v137_v11   ;;  %145 = vperm.xlu0 %423, %v136_v12   ;;  %v242_v44 = vstv %s592_s3  ;;  %v130_v45 = vsel %vm129_vm1, %v127_v48, %v128_v39 }
  0x1a   :  { %181 = vperm.xlu2 %425, %v176_v13   ;;  %v78_v13 = vmul.f32 %v552_v52, %v525_v36  ;;  %v215_v39 = vsel %vm213_vm11, %v210_v38, %v211_v4 }
  0x21   :  { %187 = vperm.xlu1 %424, %v178_v14   ;;  %184 = vperm.xlu0 %423, %v177_v15   ;;  %v172_v15 = vsel %vm171_vm2, %v169_v1, %v170_v6 }
  0x22   :  { %190 = vperm.xlu2 %425, %v179_v16  }
  0x29   :  { %226 = vperm.xlu1 %424, %v219_v17   ;;  %223 = vperm.xlu0 %423, %v218_v18   ;;  %v214_v18 = vsel %vm213_vm11, %v211_v4, %v212_v5 }
  0x2a   :  { %229 = vperm.xlu2 %425, %v220_v19  }
  0x31   :  { %232 = vperm.xlu0 %423, %v221_v20   ;;  %v173_v20 = vsel %vm171_vm2, %v168_v42, %v169_v1  ;;  %v80_v1 = vmul.f32 %v552_v52, %v520_v34 }
  0x64   :  { %v492_v21 = vpop.permute.xlu2 %139 }
  0x65   :  { %vm832_vm5 = vcmp.eq.s32.totalorder %v492_v21, 1 }
  0x66   :  { %v154_v2 = vsel %vm832_vm5, %v133_v49, 0.0 }
  0x67   :  { %v159_v11 = vmul.f32 %v548_v50, %v154_v2 }
  0x6c   :  { %v494_v22 = vpop.permute.xlu2 %142 }
  0x6d   :  { %vm151_vm9 = vcmp.eq.s32.totalorder %v494_v22, 1 }
  0x6e   :  { %v155_v16 = vsel %vm151_vm9, %v132_v51, 0.0 }
  0x6f   :  { %v160_v36 = vmul.f32 %v548_v50, %v155_v16 }
  0x74   :  { %v500_v25 = vpop.permute.xlu2 %181 }
  0x75   :  { %vm830_vm10 = vcmp.eq.s32.totalorder %v500_v25, 1 }
  0x76   :  { %v196_v17 = vsel %vm830_vm10, %v174_v53, 0.0 }
  0x7b   :  { %v496_v23 = vpop.permute.xlu1 %103  ;;  %v498_v24 = vpop.permute.xlu0 %97 }
  0x7c   :  { %v540_v46 = vpop.permute.xlu2 %190  ;;  %vm108_vm4 = vcmp.eq.s32.totalorder %v498_v24, 1  ;;  %vm110_vm6 = vcmp.eq.s32.totalorder %v496_v23, 1 }
  0x7d   :  { %v112_v0 = vsel %vm108_vm4, %v91_v55, 0.0  ;;  %v114_v3 = vsel %vm110_vm6, %v89_v58, 0.0  ;;  %v201_v55 = vmul.f32 %v558_v54, %v196_v17  ;;  %vm833_vm10 = vcmp.eq.s32.totalorder %v540_v46, 1 }
  0x7e   :  { %v117_v7 = vmul.f32 %v573_v60, %v112_v0  ;;  %v119_v12 = vmul.f32 %v573_v60, %v114_v3  ;;  %v175_v0 = vsel %vm171_vm2, %v170_v6, %v167_v41 }
  0x7f   :  { %v199_v16 = vsel %vm833_vm10, %v175_v0, 0.0 }
  0x80   :  { %v121_v30 = vadd.f32 %v117_v7, %v77_v61  ;;  %v123_v40 = vadd.f32 %v119_v12, %v79_v59 }
  0x82   :  { %v163_v58 = vadd.f32 %v159_v11, %v121_v30 }
  0x83   :  { %v514_v31 = vpop.permute.xlu1 %106  ;;  %v516_v32 = vpop.permute.xlu0 %100 }
  0x84   :  { %vm109_vm7 = vcmp.eq.s32.totalorder %v516_v32, 1  ;;  %v609_v14 = vpop.permute.xlu2 %229  ;;  %vm111_vm14 = vcmp.eq.s32.totalorder %v514_v31, 1  ;;  %v205_v6 = vadd.f32 %v201_v55, %v163_v58 }
  0x85   :  { %v113_v9 = vsel %vm109_vm7, %v90_v62, 0.0  ;;  %vm236_vm15 = vcmp.eq.s32.totalorder %v609_v14, 1  ;;  %v115_v49 = vsel %vm111_vm14, %v88_v8, 0.0 }
  0x86   :  { %v118_v28 = vmul.f32 %v573_v60, %v113_v9  ;;  %v240_v59 = vsel %vm236_vm15, %v214_v18, 0.0  ;;  %v120_v2 = vmul.f32 %v573_v60, %v115_v49 }
  0x87   :  { %v245_v7 = vmul.f32 %v242_v44, %v240_v59 }
  0x88   :  { %v122_v51 = vadd.f32 %v118_v28, %v78_v13  ;;  %v124_v12 = vadd.f32 %v120_v2, %v80_v1 }
  0x8a   :  { %v164_v8 = vadd.f32 %v160_v36, %v122_v51 }
  0x8b   :  { %v563_v56 = vpop.permute.xlu1 %148  ;;  %v565_v57 = vpop.permute.xlu0 %145 }
  0x8c   :  { %vm152_vm8 = vcmp.eq.s32.totalorder %v565_v57, 1  ;;  %vm831_vm0 = vcmp.eq.s32.totalorder %v563_v56, 1 }
  0x8d   :  { %v156_v10 = vsel %vm152_vm8, %v131_v63, 0.0  ;;  %v157_v48 = vsel %vm831_vm0, %v130_v45, 0.0  ;;  %v216_v63 = vsel %vm213_vm11, %v209_v43, %v210_v38  ;;  %v204_v38 = vmul.f32 %v558_v54, %v199_v16 }
  0x8e   :  { %v161_v29 = vmul.f32 %v548_v50, %v156_v10  ;;  %v162_v33 = vmul.f32 %v548_v50, %v157_v48  ;;  %v217_v50 = vsel %vm213_vm11, %v212_v5, %v209_v43 }
  0x90   :  { %v165_v53 = vadd.f32 %v161_v29, %v123_v40  ;;  %v166_v17 = vadd.f32 %v162_v33, %v124_v12 }
  0x92   :  { %v208_v40 = vadd.f32 %v204_v38, %v166_v17 }
  0x93   :  { %v621_v19 = vpop.permute.xlu1 %187  ;;  %v625_v27 = vpop.permute.xlu0 %184 }
  0x94   :  { %vm194_vm12 = vcmp.eq.s32.totalorder %v621_v19, 1  ;;  %vm193_vm13 = vcmp.eq.s32.totalorder %v625_v27, 1 }
  0x95   :  { %v198_v37 = vsel %vm194_vm12, %v172_v15, 0.0  ;;  %v197_v47 = vsel %vm193_vm13, %v173_v20, 0.0 }
  0x96   :  { %v203_v42 = vmul.f32 %v558_v54, %v198_v37  ;;  %v202_v62 = vmul.f32 %v558_v54, %v197_v47 }
  0x98   :  { %v207_v61 = vadd.f32 %v203_v42, %v165_v53  ;;  %v206_v9 = vadd.f32 %v202_v62, %v164_v8 }
  0x9a   :  { %v678_v60 = vadd.f32 %v245_v7, %v207_v61 }
  0x9b   :  { %v667_v3 = vpop.permute.xlu1 %226  ;;  %v669_v4 = vpop.permute.xlu0 %223 }
  0x9c   :  { %vm235_vm0 = vcmp.eq.s32.totalorder %v667_v3, 1  ;;  %vm234_vm5 = vcmp.eq.s32.totalorder %v669_v4, 1  ;;  %v253_v28 = vrot.slane %v678_v60, 6  ;;  %v269_v36 = vrot.slane %v678_v60, 7 }
  0x9d   :  { %v239_v41 = vsel %vm235_vm0, %v215_v39, 0.0  ;;  %v238_v52 = vsel %vm234_vm5, %v216_v63, 0.0  ;;  %v301_v58 = vrot.slane %v678_v60, 2 }
  0x9e   :  { %v244_v10 = vmul.f32 %v242_v44, %v239_v41  ;;  %v243_v11 = vmul.f32 %v242_v44, %v238_v52 }
  0xa0   :  { %v248_v13 = vadd.f32 %v244_v10, %v206_v9  ;;  %v680_v15 = vadd.f32 %v243_v11, %v205_v6 }
  0xa2   :  { %v252_v18 = vrot.slane %v248_v13, 6  ;;  %v268_v20 = vrot.slane %v248_v13, 7  ;;  %v251_v29 = vrot.slane %v680_v15, 6  ;;  %v267_v30 = vrot.slane %v680_v15, 7 }
  0xa3   :  { %v691_v37 = vpop.permute.xlu0 %232  ;;  %v284_v47 = vrot.slane %v248_v13, 1  ;;  %v300_v51 = vrot.slane %v248_v13, 2  ;;  %v283_v2 = vrot.slane %v680_v15, 1 }
  0xa4   :  { %vm237_vm10 = vcmp.eq.s32.totalorder %v691_v37, 1  ;;  %v256_v34 = vsel %vm87_vm3, %v252_v18, %v253_v28  ;;  %v257_v43 = vsel %vm87_vm3, %v251_v29, %v252_v18  ;;  %v273_v45 = vsel %vm129_vm1, %v267_v30, %v268_v20 }
  0xa5   :  { %v241_v5 = vsel %vm237_vm10, %v217_v50, 0.0  ;;  %v260_v54 = vsel %vm109_vm7, %v257_v43, -inf  ;;  %v261_v49 = vsel %vm110_vm6, %v256_v34, -inf  ;;  %v272_v59 = vsel %vm129_vm1, %v268_v20, %v269_v36 }
  0xa6   :  { %v246_v42 = vmul.f32 %v242_v44, %v241_v5  ;;  %v264_v55 = vmax.f32 %v248_v13, %v260_v54  ;;  %v285_v44 = vrot.slane %v678_v60, 1  ;;  %v276_v39 = vsel %vm151_vm9, %v273_v45, -inf }
  0xa7   :  { %v265_v62 = vmax.f32 %v678_v60, %v261_v49  ;;  %v304_v1 = vsel %vm213_vm11, %v300_v51, %v301_v58  ;;  %v277_v33 = vsel %vm152_vm8, %v272_v59, -inf  ;;  %v299_v60 = vrot.slane %v680_v15, 2 }
  0xa8   :  { %v250_v53 = vadd.f32 %v246_v42, %v208_v40  ;;  %v280_v63 = vmax.f32 %v264_v55, %v276_v39  ;;  %v288_v0 = vsel %vm171_vm2, %v284_v47, %v285_v44  ;;  %v308_v57 = vsel %vm235_vm0, %v304_v1, -inf }
  0xa9   :  { %v292_v6 = vsel %vm193_vm13, %v288_v0, -inf  ;;  %v281_v52 = vmax.f32 %v265_v62, %v277_v33  ;;  %v289_v16 = vsel %vm171_vm2, %v283_v2, %v284_v47  ;;  %v305_v31 = vsel %vm213_vm11, %v299_v60, %v300_v51 }
  0xaa   :  { %v254_v48 = vrot.slane %v250_v53, 6  ;;  %v286_v61 = vrot.slane %v250_v53, 1  ;;  %v302_v32 = vrot.slane %v250_v53, 2  ;;  %v270_v23 = vrot.slane %v250_v53, 7 }
  0xab   :  { %v296_v10 = vmax.f32 %v280_v63, %v292_v6  ;;  %vm836_vm6 = vcmp.eq.s32.totalorder %v563_v56, 1  ;;  %v46_v54 = vand.u32 127, %v45_v26  ;;  %vm403_vm9 = vcmask 7168  }
  0xac   :  { %v255_v7 = vsel %vm87_vm3, %v253_v28, %v254_v48  ;;  %v258_v22 = vsel %vm87_vm3, %v254_v48, %v251_v29  ;;  %v287_v8 = vsel %vm171_vm2, %v285_v44, %v286_v61  ;;  %v303_v41 = vsel %vm213_vm11, %v301_v58, %v302_v32 }
  0xad   :  { %v274_v9 = vsel %vm129_vm1, %v270_v23, %v267_v30  ;;  %v293_v11 = vsel %vm194_vm12, %v287_v8, -inf  ;;  %v262_v12 = vsel %vm111_vm14, %v255_v7, -inf  ;;  %v259_v27 = vsel %vm108_vm4, %v258_v22, -inf  ;;  %v426_v7 = vld [vmem:[%s828_s4] ss:$0 sm:$0xff] }
  0xae   :  { %v297_v13 = vmax.f32 %v281_v52, %v293_v11  ;;  %v309_v50 = vsel %vm236_vm15, %v303_v41, -inf  ;;  %v747_v17 = vmax.f32 %v296_v10, %v308_v57  ;;  %v263_v19 = vmax.f32 %v680_v15, %v259_v27 }
  0xaf   :  { %vm834_vm3 = vcmp.eq.s32.totalorder %v492_v21, 1  ;;  %v266_v20 = vmax.f32 %v250_v53, %v262_v12  ;;  %v271_v24 = vsel %vm129_vm1, %v269_v36, %v270_v23  ;;  %vm835_vm4 = vcmp.eq.s32.totalorder %v500_v25, 1 }
  0xb0   :  { %v313_v18 = vmax.f32 %v297_v13, %v309_v50  ;;  %v275_v3 = vsel %vm834_vm3, %v274_v9, -inf  ;;  %317 = vrot.lane.b32.xlu2 %v747_v17, %s443_s15  ;;  %v291_v28 = vsel %vm835_vm4, %v289_v16, -inf  ;;  %v307_v21 = vsel %vm234_vm5, %v305_v31, -inf }
  0xb1   :  { %v279_v14 = vmax.f32 %v263_v19, %v275_v3  ;;  %v278_v29 = vsel %vm836_vm6, %v271_v24, -inf  ;;  %v290_v38 = vsel %vm171_vm2, %v286_v61, %v283_v2  ;;  %vm837_vm1 = vcmp.eq.s32.totalorder %v540_v46, 1 }
  0xb2   :  { %319 = vrot.lane.b32.xlu0 %v313_v18, %s443_s15  ;;  %v282_v30 = vmax.f32 %v266_v20, %v278_v29  ;;  %v294_v5 = vsel %vm837_vm1, %v290_v38, -inf  ;;  %v306_v40 = vsel %vm213_vm11, %v302_v32, %v299_v60  ;;  %vm63_vm2 = vcmp.ge.s32.totalorder %v46_v54, 2 }
  0xb3   :  { %v295_v15 = vmax.f32 %v279_v14, %v291_v28  ;;  %v310_v56 = vsel %vm237_vm10, %v306_v40, -inf  ;;  %vm64_vm5 = vcmp.ge.s32.totalorder %v46_v54, 1  ;;  %vm65_vm7 = vcmp.lt.s32.totalorder %v46_v54, 63 }
  0xb4   :  { %v298_v25 = vmax.f32 %v282_v30, %v294_v5  ;;  %vm66_vm8 = vcmp.lt.s32.totalorder %v46_v54, 62 }
  0xb5   :  { %v765_v34 = vmax.f32 %v295_v15, %v307_v21  ;;  %v394_v21 = vstv %s825_s1 }
  0xb6   :  { %v776_v4 = vmax.f32 %v298_v25, %v310_v56 }
  0xb7   :  { %315 = vrot.lane.b32.xlu1 %v765_v34, %s443_s15 }
  0xb8   :  { %331 = vrot.lane.b32.xlu2 %v765_v34, %s444_s16 }
  0xba   :  { %333 = vrot.lane.b32.xlu0 %v747_v17, %s444_s16 }
  0xbf   :  { %321 = vrot.lane.b32.xlu1 %v776_v4, %s443_s15 }
  0xc0   :  { %337 = vrot.lane.b32.xlu2 %v776_v4, %s444_s16 }
  0xc2   :  { %347 = vrot.lane.b32.xlu0 %v765_v34, %s445_s17 }
  0xc7   :  { %335 = vrot.lane.b32.xlu1 %v313_v18, %s444_s16 }
  0xc8   :  { %351 = vrot.lane.b32.xlu2 %v313_v18, %s445_s17 }
  0xca   :  { %353 = vrot.lane.b32.xlu0 %v776_v4, %s445_s17 }
  0xcf   :  { %349 = vrot.lane.b32.xlu1 %v747_v17, %s445_s17 }
  0xd0   :  { %365 = vrot.lane.b32.xlu2 %v747_v17, %s446_s18 }
  0xd2   :  { %367 = vrot.lane.b32.xlu0 %v313_v18, %s446_s18 }
  0xd7   :  { %363 = vrot.lane.b32.xlu1 %v765_v34, %s446_s18 }
  0xdf   :  { %369 = vrot.lane.b32.xlu1 %v776_v4, %s446_s18 }
 0x10a   :  { %v318_v35 = vpop.permute.xlu2 %317 }
 0x10b   :  { %v324_v55 = vsel %vm63_vm2, %v318_v35, -inf }
 0x10c   :  { %v328_v48 = vmax.f32 %v747_v17, %v324_v55 }
 0x112   :  { %v332_v46 = vpop.permute.xlu2 %331 }
 0x113   :  { %v339_v52 = vsel %vm64_vm5, %v332_v46, -inf }
 0x11a   :  { %v338_v45 = vpop.permute.xlu2 %337 }
 0x122   :  { %v352_v49 = vpop.permute.xlu2 %351 }
 0x123   :  { %v357_v0 = vsel %vm65_vm7, %v352_v49, -inf }
 0x124   :  { %v320_v37 = vpop.permute.xlu0 %319 }
 0x125   :  { %v325_v53 = vsel %vm63_vm2, %v320_v37, -inf }
 0x126   :  { %v329_v59 = vmax.f32 %v313_v18, %v325_v53  ;;  %v342_v18 = vsel %vm64_vm5, %v338_v45, -inf }
 0x129   :  { %v316_v42 = vpop.permute.xlu1 %315 }
 0x12a   :  { %v323_v61 = vsel %vm63_vm2, %v316_v42, -inf  ;;  %v366_v32 = vpop.permute.xlu2 %365 }
 0x12b   :  { %v327_v1 = vmax.f32 %v765_v34, %v323_v61  ;;  %v372_v22 = vsel %vm66_vm8, %v366_v32, -inf }
 0x12c   :  { %v334_v43 = vpop.permute.xlu0 %333 }
 0x12d   :  { %v340_v39 = vsel %vm64_vm5, %v334_v43, -inf  ;;  %v343_v10 = vmax.f32 %v327_v1, %v339_v52 }
 0x12e   :  { %v344_v62 = vmax.f32 %v328_v48, %v340_v39 }
 0x131   :  { %v322_v47 = vpop.permute.xlu1 %321 }
 0x132   :  { %v326_v57 = vsel %vm63_vm2, %v322_v47, -inf }
 0x133   :  { %v330_v50 = vmax.f32 %v776_v4, %v326_v57 }
 0x134   :  { %v348_v36 = vpop.permute.xlu0 %347 }
 0x135   :  { %v355_v60 = vsel %vm65_vm7, %v348_v36, -inf  ;;  %v346_v31 = vmax.f32 %v330_v50, %v342_v18 }
 0x136   :  { %v359_v13 = vmax.f32 %v343_v10, %v355_v60 }
 0x139   :  { %v336_v51 = vpop.permute.xlu1 %335 }
 0x13a   :  { %v341_v58 = vsel %vm64_vm5, %v336_v51, -inf }
 0x13b   :  { %v345_v26 = vmax.f32 %v329_v59, %v341_v58 }
 0x13c   :  { %v354_v44 = vpop.permute.xlu0 %353 }
 0x13d   :  { %v361_v33 = vmax.f32 %v345_v26, %v357_v0  ;;  %v358_v3 = vsel %vm65_vm7, %v354_v44, -inf }
 0x13e   :  { %v362_v20 = vmax.f32 %v346_v31, %v358_v3 }
 0x141   :  { %v350_v23 = vpop.permute.xlu1 %349 }
 0x142   :  { %v356_v63 = vsel %vm65_vm7, %v350_v23, -inf }
 0x143   :  { %v360_v2 = vmax.f32 %v344_v62, %v356_v63 }
 0x144   :  { %v368_v8 = vpop.permute.xlu0 %367 }
 0x145   :  { %v373_v41 = vsel %vm66_vm8, %v368_v8, -inf  ;;  %v376_v6 = vmax.f32 %v360_v2, %v372_v22 }
 0x146   :  { %v377_v9 = vmax.f32 %v361_v33, %v373_v41 }
 0x147   :  { %v383_v11 = vmul.f32 %v426_v7, %v376_v6 }
 0x148   :  { %v384_v12 = vmul.f32 %v426_v7, %v377_v9 }
 0x149   :  { %v364_v27 = vpop.permute.xlu1 %363  ;;  %388 = vadd.xlane.f32.xlu0 %v383_v11 }
 0x14a   :  { %v371_v16 = vsel %vm66_vm8, %v364_v27, -inf  ;;  %390 = vadd.xlane.f32.xlu1 %v384_v12 }
 0x14b   :  { %v375_v17 = vmax.f32 %v359_v13, %v371_v16 }
 0x14d   :  { %v382_v19 = vmul.f32 %v426_v7, %v375_v17 }
 0x14f   :  { %386 = vadd.xlane.f32.xlu2 %v382_v19 }
 0x151   :  { %v370_v24 = vpop.permute.xlu1 %369 }
 0x152   :  { %v374_v14 = vsel %vm66_vm8, %v370_v24, -inf }
 0x153   :  { %v378_v28 = vmax.f32 %v362_v20, %v374_v14 }
 0x155   :  { %v385_v15 = vmul.f32 %v426_v7, %v378_v28 }
 0x157   :  { %392 = vadd.xlane.f32.xlu2 %v385_v15 }
 0x1bc   :  { %v389_v29 = vpop.xlane.xlu0 %388 }
 0x1bd   :  { %v396_v30 = vadd.f32 %v394_v21, %v389_v29  ;;  %v391_v38 = vpop.xlane.xlu1 %390 }
 0x1be   :  { %v397_v34 = vadd.f32 %v394_v21, %v391_v38 }
 0x1bf   :  { %v400_v5 = vmax.f32 %v396_v30, 0.0 }
 0x1c0   :  { %v401_v25 = vmax.f32 %v397_v34, 0.0 }
 0x1c1   :  { %405 = vst.msk [vmem:[%s829_s5 + $0x8] sm:$0xff] %vm403_vm9, %v400_v5 }
 0x1c2   :  { %406 = vst.msk [vmem:[%s829_s5 + $0x10] sm:$0xff] %vm403_vm9, %v401_v25  ;;  %v387_v40 = vpop.xlane.xlu2 %386 }
 0x1c3   :  { %v395_v56 = vadd.f32 %v394_v21, %v387_v40 }
 0x1c5   :  { %v399_v4 = vmax.f32 %v395_v56, 0.0 }
 0x1c7   :  { %404 = vst.msk [vmem:[%s829_s5] sm:$0xff] %vm403_vm9, %v399_v4 }
 0x1ca   :  { %v393_v35 = vpop.xlane.xlu2 %392 }
 0x1cb   :  { %v398_v46 = vadd.f32 %v394_v21, %v393_v35 }
 0x1cd   :  { %v402_v37 = vmax.f32 %v398_v46, 0.0 }
 0x1cf   :  { %407 = vst.msk [vmem:[%s829_s5 + $0x18] sm:$0xff] %vm403_vm9, %v402_v37 }
 0x1d0   :  { %412 = vsyncpa [#allocation4], 1 }

// kernel: tpu_custom_call.1
= control target key start
LH: loop header
LB: loop body
LE: loop exit
PB: predicated region body
PF: predicated region fallthrough
CT: control target
= control target key end

     0   :  { %11 = vsyncpa [#allocation4], 0  ;;  %s441_s21 = smov [#allocation3]   ;;  %s824_s0 = inlined_call_operand.vmem [shape: f32[5], index: 0, kind: input, shape index: {}]   ;;  %s825_s1 = inlined_call_operand.<no memory space> [shape: f32[1], index: 1, kind: input, shape index: {}]   ;;  %s826_s2 = inlined_call_operand.vmem [shape: s32[32,1], index: 2, kind: input, shape index: {}]   ;;  %s827_s3 = inlined_call_operand.vmem [shape: f32[32,64], index: 3, kind: input, shape index: {}]   ;;  %s828_s4 = inlined_call_operand.vmem [shape: f32[1,128], index: 4, kind: input, shape index: {}]   ;;  %s829_s5 = inlined_call_operand.vmem [shape: f32[32,1], index: 5, kind: output, shape index: {}]  }
   0x1   :  { %s17_s20 = sshll.u32 %s824_s0, 4  ;;  %s18_s20 = int_to_ptr.vmem [resolvable:$true] %s17_s20 }
   0x2   :  { %20 = dma.vmem_to_smem %s18_s20, 16, %s441_s21, [#allocation4]  }
   0x3   :  { %439 = dma.done.wait [#allocation4], 16  }
   0x4   :  { %440 = vsyncadd [#allocation4], 4294967280 }
   0x5   :  { %33 = sfence }
   0x6   :  { %v43_v0 = vld [vmem:[%s826_s2 + $0x10] sm:$0xff]  ;;  %v41_v1 = vld [vmem:[%s826_s2] sm:$0xff]  ;;  %v442_v2 = vmov 0   ;;  %v44_v6 = vld [vmem:[%s826_s2 + $0x18] sm:$0xff]  ;;  %v45_v26 = vlaneseq  ;;  %s413_s7 = sld [smem:[#allocation3 + $0x1]]  ;;  %s443_s15 = smov 2  }
   0x7   :  { %424 = vset.pattern.permute.xlu1 %v442_v2  ;;  %423 = vset.pattern.permute.xlu0 %v442_v2  ;;  %vm49_vm0 = vcmp.ge.s32.totalorder %v43_v0, 2  ;;  %vm47_vm1 = vcmp.ge.s32.totalorder %v41_v1, 2  ;;  %vm51_vm2 = vcmp.ge.s32.totalorder %v41_v1, 1  ;;  %v42_v7 = vld [vmem:[%s826_s2 + $0x8] sm:$0xff]  ;;  %vm50_vm3 = vcmp.ge.s32.totalorder %v44_v6, 2  ;;  %v67_v27 = vld [vmem:[%s827_s3] sm:$0xff] }
   0x8   :  { %v94_v3 = vsel %vm49_vm0, 1, %v442_v2  ;;  %v92_v4 = vsel %vm47_vm1, 1, %v442_v2  ;;  %425 = vset.pattern.permute.xlu2 %v442_v2  ;;  %v134_v5 = vsel %vm51_vm2, 1, %v442_v2  ;;  %vm48_vm4 = vcmp.ge.s32.totalorder %v42_v7, 2  ;;  %v70_v28 = vld [vmem:[%s827_s3 + $0x18] sm:$0xff]  ;;  %v68_v29 = vld [vmem:[%s827_s3 + $0x8] sm:$0xff] }
   0x9   :  { %103 = vperm.xlu1 %424, %v94_v3   ;;  %97 = vperm.xlu0 %423, %v92_v4   ;;  %vm52_vm5 = vcmp.ge.s32.totalorder %v42_v7, 1  ;;  %v95_v8 = vsel %vm50_vm3, 1, %v442_v2  ;;  %v93_v9 = vsel %vm48_vm4, 1, %v442_v2  ;;  %vm54_vm6 = vcmp.ge.s32.totalorder %v44_v6, 1  ;;  %v69_v30 = vld [vmem:[%s827_s3 + $0x10] sm:$0xff]  ;;  %s414_s12 = sld [smem:[#allocation3 + $0x2]] }
   0xa   :  { %139 = vperm.xlu2 %425, %v134_v5   ;;  %v135_v10 = vsel %vm52_vm5, 1, %v442_v2  ;;  %vm53_vm7 = vcmp.ge.s32.totalorder %v43_v0, 1  ;;  %vm55_vm8 = vcmp.lt.s32.totalorder %v41_v1, 15  ;;  %v137_v11 = vsel %vm54_vm6, 1, %v442_v2  ;;  %s415_s13 = sld [smem:[#allocation3 + $0x3]]  ;;  %s444_s16 = smov 1  }
   0xb   :  { %v136_v12 = vsel %vm53_vm7, 1, %v442_v2  ;;  %v176_v13 = vsel %vm55_vm8, 1, %v442_v2  ;;  %vm57_vm9 = vcmp.lt.s32.totalorder %v43_v0, 15  ;;  %vm56_vm10 = vcmp.lt.s32.totalorder %v42_v7, 15  ;;  %s34_s14 = sld [smem:[#allocation3]]  ;;  %s445_s17 = smov 127  }
   0xc   :  { %vm58_vm11 = vcmp.lt.s32.totalorder %v44_v6, 15  ;;  %v178_v14 = vsel %vm57_vm9, 1, %v442_v2  ;;  %v177_v15 = vsel %vm56_vm10, 1, %v442_v2  ;;  %vm60_vm12 = vcmp.lt.s32.totalorder %v42_v7, 14  ;;  %s592_s3 = sld [smem:[#allocation3 + $0x4]]  ;;  %s446_s18 = smov 126  }
   0xd   :  { %v179_v16 = vsel %vm58_vm11, 1, %v442_v2  ;;  %vm59_vm13 = vcmp.lt.s32.totalorder %v41_v1, 14  ;;  %vm61_vm14 = vcmp.lt.s32.totalorder %v43_v0, 14  ;;  %v219_v17 = vsel %vm60_vm12, 1, %v442_v2 }
   0xe   :  { %v218_v18 = vsel %vm59_vm13, 1, %v442_v2  ;;  %v220_v19 = vsel %vm61_vm14, 1, %v442_v2  ;;  %vm62_vm15 = vcmp.lt.s32.totalorder %v44_v6, 14  ;;  %vm71_vm0 = vcmask 523264  }
   0xf   :  { %v221_v20 = vsel %vm62_vm15, 1, %v442_v2  ;;  %v518_v33 = vsel %vm71_vm0, %v67_v27, 0.0  ;;  %v520_v34 = vsel %vm71_vm0, %v70_v28, 0.0  ;;  %v523_v35 = vshrl.u32 %v45_v26, 7 }
  0x10   :  { %v525_v36 = vsel %vm71_vm0, %v68_v29, 0.0  ;;  %v527_v37 = vsel %vm71_vm0, %v69_v30, 0.0  ;;  %v125_v38 = vrot.slane %v518_v33, 7  ;;  %v128_v39 = vrot.slane %v520_v34, 7 }
  0x11   :  { %106 = vperm.xlu1 %424, %v95_v8   ;;  %100 = vperm.xlu0 %423, %v93_v9   ;;  %vm129_vm1 = vcmp.lt.s32.totalorder %v523_v35, 1  ;;  %v126_v40 = vrot.slane %v525_v36, 7  ;;  %v167_v41 = vrot.slane %v518_v33, 1  ;;  %v168_v42 = vrot.slane %v525_v36, 1 }
  0x12   :  { %142 = vperm.xlu2 %425, %v135_v10   ;;  %v81_v43 = vrot.slane %v518_v33, 6  ;;  %v84_v44 = vrot.slane %v520_v34, 6  ;;  %vm171_vm2 = vcmp.lt.s32.totalorder %v523_v35, 7  ;;  %v83_v45 = vrot.slane %v527_v37, 6 }
  0x13   :  { %vm87_vm3 = vcmp.lt.s32.totalorder %v523_v35, 2  ;;  %v82_v47 = vrot.slane %v525_v36, 6  ;;  %v127_v48 = vrot.slane %v527_v37, 7  ;;  %v133_v49 = vsel %vm129_vm1, %v128_v39, %v125_v38 }
  0x14   :  { %v548_v50 = vstv %s413_s7  ;;  %v132_v51 = vsel %vm129_vm1, %v125_v38, %v126_v40  ;;  %v552_v52 = vstv %s414_s12  ;;  %v174_v53 = vsel %vm171_vm2, %v167_v41, %v168_v42 }
  0x15   :  { %v558_v54 = vstv %s415_s13  ;;  %v91_v55 = vsel %vm87_vm3, %v84_v44, %v81_v43  ;;  %v89_v58 = vsel %vm87_vm3, %v82_v47, %v83_v45  ;;  %v79_v59 = vmul.f32 %v552_v52, %v527_v37 }
  0x16   :  { %v573_v60 = vstv %s34_s14  ;;  %v77_v61 = vmul.f32 %v552_v52, %v518_v33  ;;  %v90_v62 = vsel %vm87_vm3, %v81_v43, %v82_v47  ;;  %v131_v63 = vsel %vm129_vm1, %v126_v40, %v127_v48 }
  0x17   :  { %v169_v1 = vrot.slane %v527_v37, 1  ;;  %v211_v4 = vrot.slane %v527_v37, 2  ;;  %v212_v5 = vrot.slane %v520_v34, 2  ;;  %v170_v6 = vrot.slane %v520_v34, 1 }
  0x18   :  { %vm213_vm11 = vcmp.lt.s32.totalorder %v523_v35, 6  ;;  %v88_v8 = vsel %vm87_vm3, %v83_v45, %v84_v44  ;;  %v210_v38 = vrot.slane %v525_v36, 2  ;;  %v209_v43 = vrot.slane %v518_v33, 2 }
  0x19   :  { %148 = vperm.xlu1 %424, %v137_v11   ;;  %145 = vperm.xlu0 %423, %v136_v12   ;;  %v242_v44 = vstv %s592_s3  ;;  %v130_v45 = vsel %vm129_vm1, %v127_v48, %v128_v39 }
  0x1a   :  { %181 = vperm.xlu2 %425, %v176_v13   ;;  %v78_v13 = vmul.f32 %v552_v52, %v525_v36  ;;  %v215_v39 = vsel %vm213_vm11, %v210_v38, %v211_v4 }
  0x21   :  { %187 = vperm.xlu1 %424, %v178_v14   ;;  %184 = vperm.xlu0 %423, %v177_v15   ;;  %v172_v15 = vsel %vm171_vm2, %v169_v1, %v170_v6 }
  0x22   :  { %190 = vperm.xlu2 %425, %v179_v16  }
  0x29   :  { %226 = vperm.xlu1 %424, %v219_v17   ;;  %223 = vperm.xlu0 %423, %v218_v18   ;;  %v214_v18 = vsel %vm213_vm11, %v211_v4, %v212_v5 }
  0x2a   :  { %229 = vperm.xlu2 %425, %v220_v19  }
  0x31   :  { %232 = vperm.xlu0 %423, %v221_v20   ;;  %v173_v20 = vsel %vm171_vm2, %v168_v42, %v169_v1  ;;  %v80_v1 = vmul.f32 %v552_v52, %v520_v34 }
  0x64   :  { %v492_v21 = vpop.permute.xlu2 %139 }
  0x65   :  { %vm832_vm5 = vcmp.eq.s32.totalorder %v492_v21, 1 }
  0x66   :  { %v154_v2 = vsel %vm832_vm5, %v133_v49, 0.0 }
  0x67   :  { %v159_v11 = vmul.f32 %v548_v50, %v154_v2 }
  0x6c   :  { %v494_v22 = vpop.permute.xlu2 %142 }
  0x6d   :  { %vm151_vm9 = vcmp.eq.s32.totalorder %v494_v22, 1 }
  0x6e   :  { %v155_v16 = vsel %vm151_vm9, %v132_v51, 0.0 }
  0x6f   :  { %v160_v36 = vmul.f32 %v548_v50, %v155_v16 }
  0x74   :  { %v500_v25 = vpop.permute.xlu2 %181 }
  0x75   :  { %vm830_vm10 = vcmp.eq.s32.totalorder %v500_v25, 1 }
  0x76   :  { %v196_v17 = vsel %vm830_vm10, %v174_v53, 0.0 }
  0x7b   :  { %v496_v23 = vpop.permute.xlu1 %103  ;;  %v498_v24 = vpop.permute.xlu0 %97 }
  0x7c   :  { %v540_v46 = vpop.permute.xlu2 %190  ;;  %vm108_vm4 = vcmp.eq.s32.totalorder %v498_v24, 1  ;;  %vm110_vm6 = vcmp.eq.s32.totalorder %v496_v23, 1 }
  0x7d   :  { %v112_v0 = vsel %vm108_vm4, %v91_v55, 0.0  ;;  %v114_v3 = vsel %vm110_vm6, %v89_v58, 0.0  ;;  %v201_v55 = vmul.f32 %v558_v54, %v196_v17  ;;  %vm833_vm10 = vcmp.eq.s32.totalorder %v540_v46, 1 }
  0x7e   :  { %v117_v7 = vmul.f32 %v573_v60, %v112_v0  ;;  %v119_v12 = vmul.f32 %v573_v60, %v114_v3  ;;  %v175_v0 = vsel %vm171_vm2, %v170_v6, %v167_v41 }
  0x7f   :  { %v199_v16 = vsel %vm833_vm10, %v175_v0, 0.0 }
  0x80   :  { %v121_v30 = vadd.f32 %v117_v7, %v77_v61  ;;  %v123_v40 = vadd.f32 %v119_v12, %v79_v59 }
  0x82   :  { %v163_v58 = vadd.f32 %v159_v11, %v121_v30 }
  0x83   :  { %v514_v31 = vpop.permute.xlu1 %106  ;;  %v516_v32 = vpop.permute.xlu0 %100 }
  0x84   :  { %vm109_vm7 = vcmp.eq.s32.totalorder %v516_v32, 1  ;;  %v609_v14 = vpop.permute.xlu2 %229  ;;  %vm111_vm14 = vcmp.eq.s32.totalorder %v514_v31, 1  ;;  %v205_v6 = vadd.f32 %v201_v55, %v163_v58 }
  0x85   :  { %v113_v9 = vsel %vm109_vm7, %v90_v62, 0.0  ;;  %vm236_vm15 = vcmp.eq.s32.totalorder %v609_v14, 1  ;;  %v115_v49 = vsel %vm111_vm14, %v88_v8, 0.0 }
  0x86   :  { %v118_v28 = vmul.f32 %v573_v60, %v113_v9  ;;  %v240_v59 = vsel %vm236_vm15, %v214_v18, 0.0  ;;  %v120_v2 = vmul.f32 %v573_v60, %v115_v49 }
  0x87   :  { %v245_v7 = vmul.f32 %v242_v44, %v240_v59 }
  0x88   :  { %v122_v51 = vadd.f32 %v118_v28, %v78_v13  ;;  %v124_v12 = vadd.f32 %v120_v2, %v80_v1 }
  0x8a   :  { %v164_v8 = vadd.f32 %v160_v36, %v122_v51 }
  0x8b   :  { %v563_v56 = vpop.permute.xlu1 %148  ;;  %v565_v57 = vpop.permute.xlu0 %145 }
  0x8c   :  { %vm152_vm8 = vcmp.eq.s32.totalorder %v565_v57, 1  ;;  %vm831_vm0 = vcmp.eq.s32.totalorder %v563_v56, 1 }
  0x8d   :  { %v156_v10 = vsel %vm152_vm8, %v131_v63, 0.0  ;;  %v157_v48 = vsel %vm831_vm0, %v130_v45, 0.0  ;;  %v216_v63 = vsel %vm213_vm11, %v209_v43, %v210_v38  ;;  %v204_v38 = vmul.f32 %v558_v54, %v199_v16 }
  0x8e   :  { %v161_v29 = vmul.f32 %v548_v50, %v156_v10  ;;  %v162_v33 = vmul.f32 %v548_v50, %v157_v48  ;;  %v217_v50 = vsel %vm213_vm11, %v212_v5, %v209_v43 }
  0x90   :  { %v165_v53 = vadd.f32 %v161_v29, %v123_v40  ;;  %v166_v17 = vadd.f32 %v162_v33, %v124_v12 }
  0x92   :  { %v208_v40 = vadd.f32 %v204_v38, %v166_v17 }
  0x93   :  { %v621_v19 = vpop.permute.xlu1 %187  ;;  %v625_v27 = vpop.permute.xlu0 %184 }
  0x94   :  { %vm194_vm12 = vcmp.eq.s32.totalorder %v621_v19, 1  ;;  %vm193_vm13 = vcmp.eq.s32.totalorder %v625_v27, 1 }
  0x95   :  { %v198_v37 = vsel %vm194_vm12, %v172_v15, 0.0  ;;  %v197_v47 = vsel %vm193_vm13, %v173_v20, 0.0 }
  0x96   :  { %v203_v42 = vmul.f32 %v558_v54, %v198_v37  ;;  %v202_v62 = vmul.f32 %v558_v54, %v197_v47 }
  0x98   :  { %v207_v61 = vadd.f32 %v203_v42, %v165_v53  ;;  %v206_v9 = vadd.f32 %v202_v62, %v164_v8 }
  0x9a   :  { %v678_v60 = vadd.f32 %v245_v7, %v207_v61 }
  0x9b   :  { %v667_v3 = vpop.permute.xlu1 %226  ;;  %v669_v4 = vpop.permute.xlu0 %223 }
  0x9c   :  { %vm235_vm0 = vcmp.eq.s32.totalorder %v667_v3, 1  ;;  %vm234_vm5 = vcmp.eq.s32.totalorder %v669_v4, 1  ;;  %v253_v28 = vrot.slane %v678_v60, 6  ;;  %v269_v36 = vrot.slane %v678_v60, 7 }
  0x9d   :  { %v239_v41 = vsel %vm235_vm0, %v215_v39, 0.0  ;;  %v238_v52 = vsel %vm234_vm5, %v216_v63, 0.0  ;;  %v301_v58 = vrot.slane %v678_v60, 2 }
  0x9e   :  { %v244_v10 = vmul.f32 %v242_v44, %v239_v41  ;;  %v243_v11 = vmul.f32 %v242_v44, %v238_v52 }
  0xa0   :  { %v248_v13 = vadd.f32 %v244_v10, %v206_v9  ;;  %v680_v15 = vadd.f32 %v243_v11, %v205_v6 }
  0xa2   :  { %v252_v18 = vrot.slane %v248_v13, 6  ;;  %v268_v20 = vrot.slane %v248_v13, 7  ;;  %v251_v29 = vrot.slane %v680_v15, 6  ;;  %v267_v30 = vrot.slane %v680_v15, 7 }
  0xa3   :  { %v691_v37 = vpop.permute.xlu0 %232  ;;  %v284_v47 = vrot.slane %v248_v13, 1  ;;  %v300_v51 = vrot.slane %v248_v13, 2  ;;  %v283_v2 = vrot.slane %v680_v15, 1 }
  0xa4   :  { %vm237_vm10 = vcmp.eq.s32.totalorder %v691_v37, 1  ;;  %v256_v34 = vsel %vm87_vm3, %v252_v18, %v253_v28  ;;  %v257_v43 = vsel %vm87_vm3, %v251_v29, %v252_v18  ;;  %v273_v45 = vsel %vm129_vm1, %v267_v30, %v268_v20 }
  0xa5   :  { %v241_v5 = vsel %vm237_vm10, %v217_v50, 0.0  ;;  %v260_v54 = vsel %vm109_vm7, %v257_v43, -inf  ;;  %v261_v49 = vsel %vm110_vm6, %v256_v34, -inf  ;;  %v272_v59 = vsel %vm129_vm1, %v268_v20, %v269_v36 }
  0xa6   :  { %v246_v42 = vmul.f32 %v242_v44, %v241_v5  ;;  %v264_v55 = vmax.f32 %v248_v13, %v260_v54  ;;  %v285_v44 = vrot.slane %v678_v60, 1  ;;  %v276_v39 = vsel %vm151_vm9, %v273_v45, -inf }
  0xa7   :  { %v265_v62 = vmax.f32 %v678_v60, %v261_v49  ;;  %v304_v1 = vsel %vm213_vm11, %v300_v51, %v301_v58  ;;  %v277_v33 = vsel %vm152_vm8, %v272_v59, -inf  ;;  %v299_v60 = vrot.slane %v680_v15, 2 }
  0xa8   :  { %v250_v53 = vadd.f32 %v246_v42, %v208_v40  ;;  %v280_v63 = vmax.f32 %v264_v55, %v276_v39  ;;  %v288_v0 = vsel %vm171_vm2, %v284_v47, %v285_v44  ;;  %v308_v57 = vsel %vm235_vm0, %v304_v1, -inf }
  0xa9   :  { %v292_v6 = vsel %vm193_vm13, %v288_v0, -inf  ;;  %v281_v52 = vmax.f32 %v265_v62, %v277_v33  ;;  %v289_v16 = vsel %vm171_vm2, %v283_v2, %v284_v47  ;;  %v305_v31 = vsel %vm213_vm11, %v299_v60, %v300_v51 }
  0xaa   :  { %v254_v48 = vrot.slane %v250_v53, 6  ;;  %v286_v61 = vrot.slane %v250_v53, 1  ;;  %v302_v32 = vrot.slane %v250_v53, 2  ;;  %v270_v23 = vrot.slane %v250_v53, 7 }
  0xab   :  { %v296_v10 = vmax.f32 %v280_v63, %v292_v6  ;;  %vm836_vm6 = vcmp.eq.s32.totalorder %v563_v56, 1  ;;  %v46_v54 = vand.u32 127, %v45_v26  ;;  %vm403_vm9 = vcmask 7168  }
  0xac   :  { %v255_v7 = vsel %vm87_vm3, %v253_v28, %v254_v48  ;;  %v258_v22 = vsel %vm87_vm3, %v254_v48, %v251_v29  ;;  %v287_v8 = vsel %vm171_vm2, %v285_v44, %v286_v61  ;;  %v303_v41 = vsel %vm213_vm11, %v301_v58, %v302_v32 }
  0xad   :  { %v274_v9 = vsel %vm129_vm1, %v270_v23, %v267_v30  ;;  %v293_v11 = vsel %vm194_vm12, %v287_v8, -inf  ;;  %v262_v12 = vsel %vm111_vm14, %v255_v7, -inf  ;;  %v259_v27 = vsel %vm108_vm4, %v258_v22, -inf  ;;  %v426_v7 = vld [vmem:[%s828_s4] ss:$0 sm:$0xff] }
  0xae   :  { %v297_v13 = vmax.f32 %v281_v52, %v293_v11  ;;  %v309_v50 = vsel %vm236_vm15, %v303_v41, -inf  ;;  %v747_v17 = vmax.f32 %v296_v10, %v308_v57  ;;  %v263_v19 = vmax.f32 %v680_v15, %v259_v27 }
  0xaf   :  { %vm834_vm3 = vcmp.eq.s32.totalorder %v492_v21, 1  ;;  %v266_v20 = vmax.f32 %v250_v53, %v262_v12  ;;  %v271_v24 = vsel %vm129_vm1, %v269_v36, %v270_v23  ;;  %vm835_vm4 = vcmp.eq.s32.totalorder %v500_v25, 1 }
  0xb0   :  { %v313_v18 = vmax.f32 %v297_v13, %v309_v50  ;;  %v275_v3 = vsel %vm834_vm3, %v274_v9, -inf  ;;  %317 = vrot.lane.b32.xlu2 %v747_v17, %s443_s15  ;;  %v291_v28 = vsel %vm835_vm4, %v289_v16, -inf  ;;  %v307_v21 = vsel %vm234_vm5, %v305_v31, -inf }
  0xb1   :  { %v279_v14 = vmax.f32 %v263_v19, %v275_v3  ;;  %v278_v29 = vsel %vm836_vm6, %v271_v24, -inf  ;;  %v290_v38 = vsel %vm171_vm2, %v286_v61, %v283_v2  ;;  %vm837_vm1 = vcmp.eq.s32.totalorder %v540_v46, 1 }
  0xb2   :  { %319 = vrot.lane.b32.xlu0 %v313_v18, %s443_s15  ;;  %v282_v30 = vmax.f32 %v266_v20, %v278_v29  ;;  %v294_v5 = vsel %vm837_vm1, %v290_v38, -inf  ;;  %v306_v40 = vsel %vm213_vm11, %v302_v32, %v299_v60  ;;  %vm63_vm2 = vcmp.ge.s32.totalorder %v46_v54, 2 }
  0xb3   :  { %v295_v15 = vmax.f32 %v279_v14, %v291_v28  ;;  %v310_v56 = vsel %vm237_vm10, %v306_v40, -inf  ;;  %vm64_vm5 = vcmp.ge.s32.totalorder %v46_v54, 1  ;;  %vm65_vm7 = vcmp.lt.s32.totalorder %v46_v54, 63 }
  0xb4   :  { %v298_v25 = vmax.f32 %v282_v30, %v294_v5  ;;  %vm66_vm8 = vcmp.lt.s32.totalorder %v46_v54, 62 }
  0xb5   :  { %v765_v34 = vmax.f32 %v295_v15, %v307_v21  ;;  %v394_v21 = vstv %s825_s1 }
  0xb6   :  { %v776_v4 = vmax.f32 %v298_v25, %v310_v56 }
  0xb7   :  { %315 = vrot.lane.b32.xlu1 %v765_v34, %s443_s15 }
  0xb8   :  { %331 = vrot.lane.b32.xlu2 %v765_v34, %s444_s16 }
  0xba   :  { %333 = vrot.lane.b32.xlu0 %v747_v17, %s444_s16 }
  0xbf   :  { %321 = vrot.lane.b32.xlu1 %v776_v4, %s443_s15 }
  0xc0   :  { %337 = vrot.lane.b32.xlu2 %v776_v4, %s444_s16 }
  0xc2   :  { %347 = vrot.lane.b32.xlu0 %v765_v34, %s445_s17 }
  0xc7   :  { %335 = vrot.lane.b32.xlu1 %v313_v18, %s444_s16 }
  0xc8   :  { %351 = vrot.lane.b32.xlu2 %v313_v18, %s445_s17 }
  0xca   :  { %353 = vrot.lane.b32.xlu0 %v776_v4, %s445_s17 }
  0xcf   :  { %349 = vrot.lane.b32.xlu1 %v747_v17, %s445_s17 }
  0xd0   :  { %365 = vrot.lane.b32.xlu2 %v747_v17, %s446_s18 }
  0xd2   :  { %367 = vrot.lane.b32.xlu0 %v313_v18, %s446_s18 }
  0xd7   :  { %363 = vrot.lane.b32.xlu1 %v765_v34, %s446_s18 }
  0xdf   :  { %369 = vrot.lane.b32.xlu1 %v776_v4, %s446_s18 }
 0x10a   :  { %v318_v35 = vpop.permute.xlu2 %317 }
 0x10b   :  { %v324_v55 = vsel %vm63_vm2, %v318_v35, -inf }
 0x10c   :  { %v328_v48 = vmax.f32 %v747_v17, %v324_v55 }
 0x112   :  { %v332_v46 = vpop.permute.xlu2 %331 }
 0x113   :  { %v339_v52 = vsel %vm64_vm5, %v332_v46, -inf }
 0x11a   :  { %v338_v45 = vpop.permute.xlu2 %337 }
 0x122   :  { %v352_v49 = vpop.permute.xlu2 %351 }
 0x123   :  { %v357_v0 = vsel %vm65_vm7, %v352_v49, -inf }
 0x124   :  { %v320_v37 = vpop.permute.xlu0 %319 }
 0x125   :  { %v325_v53 = vsel %vm63_vm2, %v320_v37, -inf }
 0x126   :  { %v329_v59 = vmax.f32 %v313_v18, %v325_v53  ;;  %v342_v18 = vsel %vm64_vm5, %v338_v45, -inf }
 0x129   :  { %v316_v42 = vpop.permute.xlu1 %315 }
 0x12a   :  { %v323_v61 = vsel %vm63_vm2, %v316_v42, -inf  ;;  %v366_v32 = vpop.permute.xlu2 %365 }
 0x12b   :  { %v327_v1 = vmax.f32 %v765_v34, %v323_v61  ;;  %v372_v22 = vsel %vm66_vm8, %v366_v32, -inf }
 0x12c   :  { %v334_v43 = vpop.permute.xlu0 %333 }
 0x12d   :  { %v340_v39 = vsel %vm64_vm5, %v334_v43, -inf  ;;  %v343_v10 = vmax.f32 %v327_v1, %v339_v52 }
 0x12e   :  { %v344_v62 = vmax.f32 %v328_v48, %v340_v39 }
 0x131   :  { %v322_v47 = vpop.permute.xlu1 %321 }
 0x132   :  { %v326_v57 = vsel %vm63_vm2, %v322_v47, -inf }
 0x133   :  { %v330_v50 = vmax.f32 %v776_v4, %v326_v57 }
 0x134   :  { %v348_v36 = vpop.permute.xlu0 %347 }
 0x135   :  { %v355_v60 = vsel %vm65_vm7, %v348_v36, -inf  ;;  %v346_v31 = vmax.f32 %v330_v50, %v342_v18 }
 0x136   :  { %v359_v13 = vmax.f32 %v343_v10, %v355_v60 }
 0x139   :  { %v336_v51 = vpop.permute.xlu1 %335 }
 0x13a   :  { %v341_v58 = vsel %vm64_vm5, %v336_v51, -inf }
 0x13b   :  { %v345_v26 = vmax.f32 %v329_v59, %v341_v58 }
 0x13c   :  { %v354_v44 = vpop.permute.xlu0 %353 }
 0x13d   :  { %v361_v33 = vmax.f32 %v345_v26, %v357_v0  ;;  %v358_v3 = vsel %vm65_vm7, %v354_v44, -inf }
 0x13e   :  { %v362_v20 = vmax.f32 %v346_v31, %v358_v3 }
 0x141   :  { %v350_v23 = vpop.permute.xlu1 %349 }
 0x142   :  { %v356_v63 = vsel %vm65_vm7, %v350_v23, -inf }
 0x143   :  { %v360_v2 = vmax.f32 %v344_v62, %v356_v63 }
 0x144   :  { %v368_v8 = vpop.permute.xlu0 %367 }
 0x145   :  { %v373_v41 = vsel %vm66_vm8, %v368_v8, -inf  ;;  %v376_v6 = vmax.f32 %v360_v2, %v372_v22 }
 0x146   :  { %v377_v9 = vmax.f32 %v361_v33, %v373_v41 }
 0x147   :  { %v383_v11 = vmul.f32 %v426_v7, %v376_v6 }
 0x148   :  { %v384_v12 = vmul.f32 %v426_v7, %v377_v9 }
 0x149   :  { %v364_v27 = vpop.permute.xlu1 %363  ;;  %388 = vadd.xlane.f32.xlu0 %v383_v11 }
 0x14a   :  { %v371_v16 = vsel %vm66_vm8, %v364_v27, -inf  ;;  %390 = vadd.xlane.f32.xlu1 %v384_v12 }
 0x14b   :  { %v375_v17 = vmax.f32 %v359_v13, %v371_v16 }
 0x14d   :  { %v382_v19 = vmul.f32 %v426_v7, %v375_v17 }
 0x14f   :  { %386 = vadd.xlane.f32.xlu2 %v382_v19 }
 0x151   :  { %v370_v24 = vpop.permute.xlu1 %369 }
 0x152   :  { %v374_v14 = vsel %vm66_vm8, %v370_v24, -inf }
 0x153   :  { %v378_v28 = vmax.f32 %v362_v20, %v374_v14 }
 0x155   :  { %v385_v15 = vmul.f32 %v426_v7, %v378_v28 }
 0x157   :  { %392 = vadd.xlane.f32.xlu2 %v385_v15 }
 0x1bc   :  { %v389_v29 = vpop.xlane.xlu0 %388 }
 0x1bd   :  { %v396_v30 = vadd.f32 %v394_v21, %v389_v29  ;;  %v391_v38 = vpop.xlane.xlu1 %390 }
 0x1be   :  { %v397_v34 = vadd.f32 %v394_v21, %v391_v38 }
 0x1bf   :  { %v400_v5 = vmax.f32 %v396_v30, 0.0 }
 0x1c0   :  { %v401_v25 = vmax.f32 %v397_v34, 0.0 }
 0x1c1   :  { %405 = vst.msk [vmem:[%s829_s5 + $0x8] sm:$0xff] %vm403_vm9, %v400_v5 }
 0x1c2   :  { %406 = vst.msk [vmem:[%s829_s5 + $0x10] sm:$0xff] %vm403_vm9, %v401_v25  ;;  %v387_v40 = vpop.xlane.xlu2 %386 }
 0x1c3   :  { %v395_v56 = vadd.f32 %v394_v21, %v387_v40 }
 0x1c5   :  { %v399_v4 = vmax.f32 %v395_v56, 0.0 }
 0x1c7   :  { %404 = vst.msk [vmem:[%s829_s5] sm:$0xff] %vm403_vm9, %v399_v4 }
 0x1ca   :  { %v393_v35 = vpop.xlane.xlu2 %392 }
 0x1cb   :  { %v398_v46 = vadd.f32 %v394_v21, %v393_v35 }
 0x1cd   :  { %v402_v37 = vmax.f32 %v398_v46, 0.0 }
 0x1cf   :  { %407 = vst.msk [vmem:[%s829_s5 + $0x18] sm:$0xff] %vm403_vm9, %v402_v37 }
 0x1d0   :  { %412 = vsyncpa [#allocation4], 1 }

</bundles_post_ra>
